<compile_context>
chip_gen: v5e
topology: v5e:2x2
jax: 0.10.0
libtpu: 0.0.40
codegen_flags: <defaults>
</compile_context>

<pallas_src>
import functools
import math

import jax
import jax.numpy as jnp
import numpy as np
from jax import lax
from jax.experimental import pallas as pl
from jax.experimental.pallas import tpu as pltpu


def _round_up(x, m):
    return (x + m - 1) // m * m


def _pad_to(a, shape):
    return jnp.pad(a, [(0, s - d) for d, s in zip(a.shape, shape)])


def rnn_chunk_kernel(tok_ref,        # scalar prefetch (SMEM): (S * B_pad,) int32, time-major
                     h0_ref,         # (1, B_pad, H_pad)  initial hidden state
                     wihb_ref,       # (V_pad, H_pad)     W_ih^T with (b_ih + b_hh) folded in
                     whh_ref,        # (H_pad, H_pad)     W_hh^T
                     wfc_ref,        # (H_pad, V_pad)     W_fc^T
                     bfc_ref,        # (1, V_pad)         b_fc
                     logits_ref,     # out: (T_CHUNK, B_pad, V_pad)
                     hN_ref,         # out: (1, B_pad, H_pad), resident (constant index_map)
                     h_carry,        # VMEM scratch: (B_pad, H_pad) carried hidden state
                     hs_scratch,     # VMEM scratch: (T_CHUNK, B_pad, H_pad) chunk hidden states
                     *, t_chunk, b_pad):
    c = pl.program_id(0)

    @pl.when(c == 0)
    def _():
        h_carry[...] = h0_ref[0]

    # Hoist the recurrent weight out of the serial loop (loop-invariant VMEM load).
    whh = whh_ref[...]

    def step(i, h_prev):
        t = c * t_chunk + i
        # Embedding gather: one_hot(tok) @ W_ih^T + b_ih + b_hh == row `tok` of (W_ih^T + b).
        rows = [wihb_ref[pl.ds(tok_ref[t * b_pad + b], 1), :] for b in range(b_pad)]
        x_t = jnp.concatenate(rows, axis=0)                       # (B_pad, H_pad)
        h_new = jnp.tanh(
            x_t + jnp.dot(h_prev, whh, preferred_element_type=jnp.float32))
        hs_scratch[i] = h_new
        return h_new

    h_last = lax.fori_loop(0, t_chunk, step, h_carry[...], unroll=True)
    h_carry[...] = h_last

    # Fused FC head, batched over the whole time chunk (one MXU-shaped matmul, lane-dense store).
    hs = hs_scratch[...].reshape(t_chunk * b_pad, hs_scratch.shape[-1])
    logits = jnp.dot(hs, wfc_ref[...], preferred_element_type=jnp.float32) + bfc_ref[...]
    logits_ref[...] = logits.reshape(logits_ref.shape)

    # Final hidden state: write the resident output block only on the last grid step.
    @pl.when(c == pl.num_programs(0) - 1)
    def _():
        hN_ref[0] = h_last


def rnn_framework_forward(tokens, h0, params, vocab_size, *, t_chunk=8):
    """tokens: (B, S) int32, h0: (1, B, H) f32. Returns (logits (S*B, V), (h_N (1, B, H),))."""
    B, S = tokens.shape
    H = h0.shape[-1]
    V = vocab_size

    if S % t_chunk != 0:
        t_chunk = math.gcd(S, t_chunk)

    B_pad = _round_up(B, 8)       # sublane alignment
    H_pad = _round_up(H, 128)     # lane alignment
    V_pad = _round_up(V, 128)     # lane alignment (lane-dense logits writeback)

    # Token ids, time-major, batch padded with token 0, flattened for a compact 1-D SMEM layout.
    tok_tm = _pad_to(tokens.T.astype(jnp.int32), (S, B_pad)).reshape(S * B_pad)

    # Fold the fused bias into the embedding table (exact): one_hot(x)@W_ih^T + b_ih + b_hh.
    wihb = params["w_ih"].T + (params["b_ih"] + params["b_hh"])[None, :]     # (V, H)
    wihb = _pad_to(wihb, (V_pad, H_pad))
    whh_t = _pad_to(params["w_hh"].T, (H_pad, H_pad))
    wfc_t = _pad_to(params["w_fc"].T, (H_pad, V_pad))
    bfc = _pad_to(params["b_fc"].reshape(1, V), (1, V_pad))
    h0_p = _pad_to(h0, (1, B_pad, H_pad))

    kernel = functools.partial(rnn_chunk_kernel, t_chunk=t_chunk, b_pad=B_pad)

    grid_spec = pltpu.PrefetchScalarGridSpec(
        num_scalar_prefetch=1,                  # token ids -> SMEM, available to kernel
        grid=(S // t_chunk,),
        in_specs=[
            pl.BlockSpec((1, B_pad, H_pad), lambda c, tok: (0, 0, 0)),   # h0
            pl.BlockSpec((V_pad, H_pad), lambda c, tok: (0, 0)),         # W_ih^T + bias (VMEM-resident)
            pl.BlockSpec((H_pad, H_pad), lambda c, tok: (0, 0)),         # W_hh^T
            pl.BlockSpec((H_pad, V_pad), lambda c, tok: (0, 0)),         # W_fc^T
            pl.BlockSpec((1, V_pad), lambda c, tok: (0, 0)),             # b_fc
        ],
        out_specs=[
            pl.BlockSpec((t_chunk, B_pad, V_pad), lambda c, tok: (c, 0, 0)),  # logits per chunk
            pl.BlockSpec((1, B_pad, H_pad), lambda c, tok: (0, 0, 0)),        # final hidden state
        ],
        scratch_shapes=[
            pltpu.VMEM((B_pad, H_pad), jnp.float32),            # carried hidden state
            pltpu.VMEM((t_chunk, B_pad, H_pad), jnp.float32),   # chunk hidden states for FC head
        ],
    )

    logits_pad, hN_pad = pl.pallas_call(
        kernel,
        grid_spec=grid_spec,
        out_shape=(
            jax.ShapeDtypeStruct((S, B_pad, V_pad), jnp.float32),
            jax.ShapeDtypeStruct((1, B_pad, H_pad), jnp.float32),
        ),
        compiler_params=pltpu.CompilerParams(
            dimension_semantics=("arbitrary",),   # time recurrence is inherently sequential
        ),
    )(tok_tm, h0_p, wihb, whh_t, wfc_t, bfc)

    logits = logits_pad[:, :B, :V].reshape(S * B, V)
    h_n = hN_pad[:, :B, :H]
    return logits, (h_n,)


def init_params(key, vocab_size, hidden):
    # PyTorch nn.RNN / nn.Linear default init: U(-1/sqrt(fan), 1/sqrt(fan)).
    ks = jax.random.split(key, 6)
    kr = 1.0 / np.sqrt(hidden)
    return {
        "w_ih": jax.random.uniform(ks[0], (hidden, vocab_size), jnp.float32, -kr, kr),
        "w_hh": jax.random.uniform(ks[1], (hidden, hidden), jnp.float32, -kr, kr),
        "b_ih": jax.random.uniform(ks[2], (hidden,), jnp.float32, -kr, kr),
        "b_hh": jax.random.uniform(ks[3], (hidden,), jnp.float32, -kr, kr),
        "w_fc": jax.random.uniform(ks[4], (vocab_size, hidden), jnp.float32, -kr, kr),
        "b_fc": jax.random.uniform(ks[5], (vocab_size,), jnp.float32, -kr, kr),
    }


def reference_forward(tokens, h0, params, vocab_size):
    """Pure-JAX reference mirroring the PyTorch module (sanity check)."""
    x = jax.nn.one_hot(tokens.T, vocab_size, dtype=jnp.float32)  # (S, B, V)

    def step(h, x_t):
        h_new = jnp.tanh(x_t @ params["w_ih"].T + params["b_ih"]
                         + h @ params["w_hh"].T + params["b_hh"])
        return h_new, h_new

    h_final, outs = jax.lax.scan(step, h0[0], x)                 # outs: (S, B, H)
    logits = outs.reshape(-1, outs.shape[-1]) @ params["w_fc"].T + params["b_fc"]
    return logits, (h_final[None],)


if __name__ == "__main__":
    BATCH, SEQ, HIDDEN, VOCAB = 2, 8, 32, 16

    key = jax.random.PRNGKey(0)
    k_tok, k_par = jax.random.split(key)
    tokens = jax.random.randint(k_tok, (BATCH, SEQ), 0, VOCAB, dtype=jnp.int32)
    params = init_params(k_par, VOCAB, HIDDEN)

    # init_hidden_states: zeros of shape (num_layers * num_directions, B, H) = (1, B, H)
    h0 = jnp.zeros((1, BATCH, HIDDEN), jnp.float32)

    logits, (h_n,) = rnn_framework_forward(tokens, h0, params, VOCAB)
    jax.block_until_ready((logits, h_n))

    ref_logits, (ref_h,) = reference_forward(tokens, h0, params, VOCAB)
    assert logits.shape == (SEQ * BATCH, VOCAB)
    assert h_n.shape == (1, BATCH, HIDDEN)
    np.testing.assert_allclose(np.asarray(logits), np.asarray(ref_logits), rtol=1e-5, atol=1e-5)
    np.testing.assert_allclose(np.asarray(h_n), np.asarray(ref_h), rtol=1e-5, atol=1e-5)

    print("KERNEL_OK")
</pallas_src>

<mosaic_0001>
module attributes {stable_mosaic.version = 11 : i64} {
  func.func @rnn_chunk_kernel(%arg0: i32, %arg1: memref<64xi32, #tpu.memory_space<smem>>, %arg2: memref<1x8x128xf32, #tpu.memory_space<vmem>>, %arg3: memref<128x128xf32, #tpu.memory_space<vmem>>, %arg4: memref<128x128xf32, #tpu.memory_space<vmem>>, %arg5: memref<128x128xf32, #tpu.memory_space<vmem>>, %arg6: memref<1x128xf32, #tpu.memory_space<vmem>>, %arg7: memref<8x8x128xf32, #tpu.memory_space<vmem>>, %arg8: memref<1x8x128xf32, #tpu.memory_space<vmem>>, %arg9: memref<8x128xf32, #tpu.memory_space<vmem>>, %arg10: memref<8x8x128xf32, #tpu.memory_space<vmem>>) attributes {dimension_semantics = [#tpu.dimension_semantics<arbitrary>], iteration_bounds = array<i64: 1>, scalar_prefetch = 1 : i64, scratch_operands = 2 : i64, tpu.core_type = #tpu.core_type<tc>, window_params = [{pipeline_mode = #tpu.pipeline_mode<synchronous>, transform_indices = @transform_0, window_bounds = array<i64: 1, 8, 128>}, {pipeline_mode = #tpu.pipeline_mode<synchronous>, transform_indices = @transform_1, window_bounds = array<i64: 128, 128>}, {pipeline_mode = #tpu.pipeline_mode<synchronous>, transform_indices = @transform_2, window_bounds = array<i64: 128, 128>}, {pipeline_mode = #tpu.pipeline_mode<synchronous>, transform_indices = @transform_3, window_bounds = array<i64: 128, 128>}, {pipeline_mode = #tpu.pipeline_mode<synchronous>, transform_indices = @transform_4, window_bounds = array<i64: 1, 128>}, {transform_indices = @transform_5, window_bounds = array<i64: 8, 8, 128>}, {pipeline_mode = #tpu.pipeline_mode<synchronous>, transform_indices = @transform_6, window_bounds = array<i64: 1, 8, 128>}]} {
    %c0_i32 = arith.constant 0 : i32
    %0 = arith.cmpi eq, %arg0, %c0_i32 : i32
    %1 = arith.extui %0 : i1 to i32
    %c0_i32_0 = arith.constant 0 : i32
    %2 = arith.cmpi ne, %1, %c0_i32_0 : i32
    scf.if %2 {
      %c0_243 = arith.constant 0 : index
      %c0_244 = arith.constant 0 : index
      %c0_245 = arith.constant 0 : index
      %482 = vector.load %arg2[%c0_243, %c0_244, %c0_245] : memref<1x8x128xf32, #tpu.memory_space<vmem>>, vector<1x8x128xf32>
      %483 = vector.shape_cast %482 : vector<1x8x128xf32> to vector<8x128xf32>
      %c0_246 = arith.constant 0 : index
      %c0_247 = arith.constant 0 : index
      %484 = vector.load %arg9[%c0_246, %c0_247] : memref<8x128xf32, #tpu.memory_space<vmem>>, vector<8x128xf32>
      tpu.vector_store %arg9[%c0_246, %c0_247], %483 {strides = array<i32>} : memref<8x128xf32, #tpu.memory_space<vmem>>, vector<8x128xf32>,
    } else {
    }
    %c0 = arith.constant 0 : index
    %c0_1 = arith.constant 0 : index
    %3 = vector.load %arg4[%c0, %c0_1] : memref<128x128xf32, #tpu.memory_space<vmem>>, vector<128x128xf32>
    %c0_2 = arith.constant 0 : index
    %c0_3 = arith.constant 0 : index
    %4 = vector.load %arg9[%c0_2, %c0_3] : memref<8x128xf32, #tpu.memory_space<vmem>>, vector<8x128xf32>
    %c0_i32_4 = arith.constant 0 : i32
    %c8_i32 = arith.constant 8 : i32
    %5 = arith.muli %arg0, %c8_i32 : i32
    %6 = arith.addi %5, %c0_i32_4 : i32
    %c8_i32_5 = arith.constant 8 : i32
    %7 = arith.muli %6, %c8_i32_5 : i32
    %c0_i32_6 = arith.constant 0 : i32
    %8 = arith.addi %7, %c0_i32_6 : i32
    %9 = arith.index_cast %8 : i32 to index
    %10 = memref.load %arg1[%9] : memref<64xi32, #tpu.memory_space<smem>>
    %11 = arith.index_cast %10 : i32 to index
    %c0_7 = arith.constant 0 : index
    %12 = vector.load %arg3[%11, %c0_7] : memref<128x128xf32, #tpu.memory_space<vmem>>, vector<1x128xf32>
    %c8_i32_8 = arith.constant 8 : i32
    %13 = arith.muli %6, %c8_i32_8 : i32
    %c1_i32 = arith.constant 1 : i32
    %14 = arith.addi %13, %c1_i32 : i32
    %15 = arith.index_cast %14 : i32 to index
    %16 = memref.load %arg1[%15] : memref<64xi32, #tpu.memory_space<smem>>
    %17 = arith.index_cast %16 : i32 to index
    %c0_9 = arith.constant 0 : index
    %18 = vector.load %arg3[%17, %c0_9] : memref<128x128xf32, #tpu.memory_space<vmem>>, vector<1x128xf32>
    %c8_i32_10 = arith.constant 8 : i32
    %19 = arith.muli %6, %c8_i32_10 : i32
    %c2_i32 = arith.constant 2 : i32
    %20 = arith.addi %19, %c2_i32 : i32
    %21 = arith.index_cast %20 : i32 to index
    %22 = memref.load %arg1[%21] : memref<64xi32, #tpu.memory_space<smem>>
    %23 = arith.index_cast %22 : i32 to index
    %c0_11 = arith.constant 0 : index
    %24 = vector.load %arg3[%23, %c0_11] : memref<128x128xf32, #tpu.memory_space<vmem>>, vector<1x128xf32>
    %c8_i32_12 = arith.constant 8 : i32
    %25 = arith.muli %6, %c8_i32_12 : i32
    %c3_i32 = arith.constant 3 : i32
    %26 = arith.addi %25, %c3_i32 : i32
    %27 = arith.index_cast %26 : i32 to index
    %28 = memref.load %arg1[%27] : memref<64xi32, #tpu.memory_space<smem>>
    %29 = arith.index_cast %28 : i32 to index
    %c0_13 = arith.constant 0 : index
    %30 = vector.load %arg3[%29, %c0_13] : memref<128x128xf32, #tpu.memory_space<vmem>>, vector<1x128xf32>
    %c8_i32_14 = arith.constant 8 : i32
    %31 = arith.muli %6, %c8_i32_14 : i32
    %c4_i32 = arith.constant 4 : i32
    %32 = arith.addi %31, %c4_i32 : i32
    %33 = arith.index_cast %32 : i32 to index
    %34 = memref.load %arg1[%33] : memref<64xi32, #tpu.memory_space<smem>>
    %35 = arith.index_cast %34 : i32 to index
    %c0_15 = arith.constant 0 : index
    %36 = vector.load %arg3[%35, %c0_15] : memref<128x128xf32, #tpu.memory_space<vmem>>, vector<1x128xf32>
    %c8_i32_16 = arith.constant 8 : i32
    %37 = arith.muli %6, %c8_i32_16 : i32
    %c5_i32 = arith.constant 5 : i32
    %38 = arith.addi %37, %c5_i32 : i32
    %39 = arith.index_cast %38 : i32 to index
    %40 = memref.load %arg1[%39] : memref<64xi32, #tpu.memory_space<smem>>
    %41 = arith.index_cast %40 : i32 to index
    %c0_17 = arith.constant 0 : index
    %42 = vector.load %arg3[%41, %c0_17] : memref<128x128xf32, #tpu.memory_space<vmem>>, vector<1x128xf32>
    %c8_i32_18 = arith.constant 8 : i32
    %43 = arith.muli %6, %c8_i32_18 : i32
    %c6_i32 = arith.constant 6 : i32
    %44 = arith.addi %43, %c6_i32 : i32
    %45 = arith.index_cast %44 : i32 to index
    %46 = memref.load %arg1[%45] : memref<64xi32, #tpu.memory_space<smem>>
    %47 = arith.index_cast %46 : i32 to index
    %c0_19 = arith.constant 0 : index
    %48 = vector.load %arg3[%47, %c0_19] : memref<128x128xf32, #tpu.memory_space<vmem>>, vector<1x128xf32>
    %c8_i32_20 = arith.constant 8 : i32
    %49 = arith.muli %6, %c8_i32_20 : i32
    %c7_i32 = arith.constant 7 : i32
    %50 = arith.addi %49, %c7_i32 : i32
    %51 = arith.index_cast %50 : i32 to index
    %52 = memref.load %arg1[%51] : memref<64xi32, #tpu.memory_space<smem>>
    %53 = arith.index_cast %52 : i32 to index
    %c0_21 = arith.constant 0 : index
    %54 = vector.load %arg3[%53, %c0_21] : memref<128x128xf32, #tpu.memory_space<vmem>>, vector<1x128xf32>
    %55 = tpu.concatenate %12, %18, %24, %30, %36, %42, %48, %54 in 0 : vector<1x128xf32>, vector<1x128xf32>, vector<1x128xf32>, vector<1x128xf32>, vector<1x128xf32>, vector<1x128xf32>, vector<1x128xf32>, vector<1x128xf32> -> vector<8x128xf32>
    %cst = arith.constant dense<0.000000e+00> : vector<8x128xf32>
    %56 = tpu.matmul %4, %3, %cst {dimension_numbers = #tpu.dot_dimension_numbers<[1], [0], [0], [1], [0, 0, 1, 1], [], []>} : vector<8x128xf32>, vector<128x128xf32>, vector<8x128xf32> -> vector<8x128xf32>
    %57 = arith.addf %55, %56 : vector<8x128xf32>
    %58 = math.tanh %57 : vector<8x128xf32>
    %59 = arith.index_cast %c0_i32_4 : i32 to index
    %c0_22 = arith.constant 0 : index
    %c0_23 = arith.constant 0 : index
    %60 = vector.load %arg10[%59, %c0_22, %c0_23] : memref<8x8x128xf32, #tpu.memory_space<vmem>>, vector<1x8x128xf32>
    %61 = vector.shape_cast %60 : vector<1x8x128xf32> to vector<8x128xf32>
    %62 = vector.shape_cast %58 : vector<8x128xf32> to vector<1x8x128xf32>
    tpu.vector_store %arg10[%59, %c0_22, %c0_23], %62 {strides = array<i32>} : memref<8x8x128xf32, #tpu.memory_space<vmem>>, vector<1x8x128xf32>,
    %c1_i32_24 = arith.constant 1 : i32
    %c8_i32_25 = arith.constant 8 : i32
    %63 = arith.muli %arg0, %c8_i32_25 : i32
    %64 = arith.addi %63, %c1_i32_24 : i32
    %c8_i32_26 = arith.constant 8 : i32
    %65 = arith.muli %64, %c8_i32_26 : i32
    %c0_i32_27 = arith.constant 0 : i32
    %66 = arith.addi %65, %c0_i32_27 : i32
    %67 = arith.index_cast %66 : i32 to index
    %68 = memref.load %arg1[%67] : memref<64xi32, #tpu.memory_space<smem>>
    %69 = arith.index_cast %68 : i32 to index
    %c0_28 = arith.constant 0 : index
    %70 = vector.load %arg3[%69, %c0_28] : memref<128x128xf32, #tpu.memory_space<vmem>>, vector<1x128xf32>
    %c8_i32_29 = arith.constant 8 : i32
    %71 = arith.muli %64, %c8_i32_29 : i32
    %c1_i32_30 = arith.constant 1 : i32
    %72 = arith.addi %71, %c1_i32_30 : i32
    %73 = arith.index_cast %72 : i32 to index
    %74 = memref.load %arg1[%73] : memref<64xi32, #tpu.memory_space<smem>>
    %75 = arith.index_cast %74 : i32 to index
    %c0_31 = arith.constant 0 : index
    %76 = vector.load %arg3[%75, %c0_31] : memref<128x128xf32, #tpu.memory_space<vmem>>, vector<1x128xf32>
    %c8_i32_32 = arith.constant 8 : i32
    %77 = arith.muli %64, %c8_i32_32 : i32
    %c2_i32_33 = arith.constant 2 : i32
    %78 = arith.addi %77, %c2_i32_33 : i32
    %79 = arith.index_cast %78 : i32 to index
    %80 = memref.load %arg1[%79] : memref<64xi32, #tpu.memory_space<smem>>
    %81 = arith.index_cast %80 : i32 to index
    %c0_34 = arith.constant 0 : index
    %82 = vector.load %arg3[%81, %c0_34] : memref<128x128xf32, #tpu.memory_space<vmem>>, vector<1x128xf32>
    %c8_i32_35 = arith.constant 8 : i32
    %83 = arith.muli %64, %c8_i32_35 : i32
    %c3_i32_36 = arith.constant 3 : i32
    %84 = arith.addi %83, %c3_i32_36 : i32
    %85 = arith.index_cast %84 : i32 to index
    %86 = memref.load %arg1[%85] : memref<64xi32, #tpu.memory_space<smem>>
    %87 = arith.index_cast %86 : i32 to index
    %c0_37 = arith.constant 0 : index
    %88 = vector.load %arg3[%87, %c0_37] : memref<128x128xf32, #tpu.memory_space<vmem>>, vector<1x128xf32>
    %c8_i32_38 = arith.constant 8 : i32
    %89 = arith.muli %64, %c8_i32_38 : i32
    %c4_i32_39 = arith.constant 4 : i32
    %90 = arith.addi %89, %c4_i32_39 : i32
    %91 = arith.index_cast %90 : i32 to index
    %92 = memref.load %arg1[%91] : memref<64xi32, #tpu.memory_space<smem>>
    %93 = arith.index_cast %92 : i32 to index
    %c0_40 = arith.constant 0 : index
    %94 = vector.load %arg3[%93, %c0_40] : memref<128x128xf32, #tpu.memory_space<vmem>>, vector<1x128xf32>
    %c8_i32_41 = arith.constant 8 : i32
    %95 = arith.muli %64, %c8_i32_41 : i32
    %c5_i32_42 = arith.constant 5 : i32
    %96 = arith.addi %95, %c5_i32_42 : i32
    %97 = arith.index_cast %96 : i32 to index
    %98 = memref.load %arg1[%97] : memref<64xi32, #tpu.memory_space<smem>>
    %99 = arith.index_cast %98 : i32 to index
    %c0_43 = arith.constant 0 : index
    %100 = vector.load %arg3[%99, %c0_43] : memref<128x128xf32, #tpu.memory_space<vmem>>, vector<1x128xf32>
    %c8_i32_44 = arith.constant 8 : i32
    %101 = arith.muli %64, %c8_i32_44 : i32
    %c6_i32_45 = arith.constant 6 : i32
    %102 = arith.addi %101, %c6_i32_45 : i32
    %103 = arith.index_cast %102 : i32 to index
    %104 = memref.load %arg1[%103] : memref<64xi32, #tpu.memory_space<smem>>
    %105 = arith.index_cast %104 : i32 to index
    %c0_46 = arith.constant 0 : index
    %106 = vector.load %arg3[%105, %c0_46] : memref<128x128xf32, #tpu.memory_space<vmem>>, vector<1x128xf32>
    %c8_i32_47 = arith.constant 8 : i32
    %107 = arith.muli %64, %c8_i32_47 : i32
    %c7_i32_48 = arith.constant 7 : i32
    %108 = arith.addi %107, %c7_i32_48 : i32
    %109 = arith.index_cast %108 : i32 to index
    %110 = memref.load %arg1[%109] : memref<64xi32, #tpu.memory_space<smem>>
    %111 = arith.index_cast %110 : i32 to index
    %c0_49 = arith.constant 0 : index
    %112 = vector.load %arg3[%111, %c0_49] : memref<128x128xf32, #tpu.memory_space<vmem>>, vector<1x128xf32>
    %113 = tpu.concatenate %70, %76, %82, %88, %94, %100, %106, %112 in 0 : vector<1x128xf32>, vector<1x128xf32>, vector<1x128xf32>, vector<1x128xf32>, vector<1x128xf32>, vector<1x128xf32>, vector<1x128xf32>, vector<1x128xf32> -> vector<8x128xf32>
    %cst_50 = arith.constant dense<0.000000e+00> : vector<8x128xf32>
    %114 = tpu.matmul %58, %3, %cst_50 {dimension_numbers = #tpu.dot_dimension_numbers<[1], [0], [0], [1], [0, 0, 1, 1], [], []>} : vector<8x128xf32>, vector<128x128xf32>, vector<8x128xf32> -> vector<8x128xf32>
    %115 = arith.addf %113, %114 : vector<8x128xf32>
    %116 = math.tanh %115 : vector<8x128xf32>
    %117 = arith.index_cast %c1_i32_24 : i32 to index
    %c0_51 = arith.constant 0 : index
    %c0_52 = arith.constant 0 : index
    %118 = vector.load %arg10[%117, %c0_51, %c0_52] : memref<8x8x128xf32, #tpu.memory_space<vmem>>, vector<1x8x128xf32>
    %119 = vector.shape_cast %118 : vector<1x8x128xf32> to vector<8x128xf32>
    %120 = vector.shape_cast %116 : vector<8x128xf32> to vector<1x8x128xf32>
    tpu.vector_store %arg10[%117, %c0_51, %c0_52], %120 {strides = array<i32>} : memref<8x8x128xf32, #tpu.memory_space<vmem>>, vector<1x8x128xf32>,
    %c2_i32_53 = arith.constant 2 : i32
    %c8_i32_54 = arith.constant 8 : i32
    %121 = arith.muli %arg0, %c8_i32_54 : i32
    %122 = arith.addi %121, %c2_i32_53 : i32
    %c8_i32_55 = arith.constant 8 : i32
    %123 = arith.muli %122, %c8_i32_55 : i32
    %c0_i32_56 = arith.constant 0 : i32
    %124 = arith.addi %123, %c0_i32_56 : i32
    %125 = arith.index_cast %124 : i32 to index
    %126 = memref.load %arg1[%125] : memref<64xi32, #tpu.memory_space<smem>>
    %127 = arith.index_cast %126 : i32 to index
    %c0_57 = arith.constant 0 : index
    %128 = vector.load %arg3[%127, %c0_57] : memref<128x128xf32, #tpu.memory_space<vmem>>, vector<1x128xf32>
    %c8_i32_58 = arith.constant 8 : i32
    %129 = arith.muli %122, %c8_i32_58 : i32
    %c1_i32_59 = arith.constant 1 : i32
    %130 = arith.addi %129, %c1_i32_59 : i32
    %131 = arith.index_cast %130 : i32 to index
    %132 = memref.load %arg1[%131] : memref<64xi32, #tpu.memory_space<smem>>
    %133 = arith.index_cast %132 : i32 to index
    %c0_60 = arith.constant 0 : index
    %134 = vector.load %arg3[%133, %c0_60] : memref<128x128xf32, #tpu.memory_space<vmem>>, vector<1x128xf32>
    %c8_i32_61 = arith.constant 8 : i32
    %135 = arith.muli %122, %c8_i32_61 : i32
    %c2_i32_62 = arith.constant 2 : i32
    %136 = arith.addi %135, %c2_i32_62 : i32
    %137 = arith.index_cast %136 : i32 to index
    %138 = memref.load %arg1[%137] : memref<64xi32, #tpu.memory_space<smem>>
    %139 = arith.index_cast %138 : i32 to index
    %c0_63 = arith.constant 0 : index
    %140 = vector.load %arg3[%139, %c0_63] : memref<128x128xf32, #tpu.memory_space<vmem>>, vector<1x128xf32>
    %c8_i32_64 = arith.constant 8 : i32
    %141 = arith.muli %122, %c8_i32_64 : i32
    %c3_i32_65 = arith.constant 3 : i32
    %142 = arith.addi %141, %c3_i32_65 : i32
    %143 = arith.index_cast %142 : i32 to index
    %144 = memref.load %arg1[%143] : memref<64xi32, #tpu.memory_space<smem>>
    %145 = arith.index_cast %144 : i32 to index
    %c0_66 = arith.constant 0 : index
    %146 = vector.load %arg3[%145, %c0_66] : memref<128x128xf32, #tpu.memory_space<vmem>>, vector<1x128xf32>
    %c8_i32_67 = arith.constant 8 : i32
    %147 = arith.muli %122, %c8_i32_67 : i32
    %c4_i32_68 = arith.constant 4 : i32
    %148 = arith.addi %147, %c4_i32_68 : i32
    %149 = arith.index_cast %148 : i32 to index
    %150 = memref.load %arg1[%149] : memref<64xi32, #tpu.memory_space<smem>>
    %151 = arith.index_cast %150 : i32 to index
    %c0_69 = arith.constant 0 : index
    %152 = vector.load %arg3[%151, %c0_69] : memref<128x128xf32, #tpu.memory_space<vmem>>, vector<1x128xf32>
    %c8_i32_70 = arith.constant 8 : i32
    %153 = arith.muli %122, %c8_i32_70 : i32
    %c5_i32_71 = arith.constant 5 : i32
    %154 = arith.addi %153, %c5_i32_71 : i32
    %155 = arith.index_cast %154 : i32 to index
    %156 = memref.load %arg1[%155] : memref<64xi32, #tpu.memory_space<smem>>
    %157 = arith.index_cast %156 : i32 to index
    %c0_72 = arith.constant 0 : index
    %158 = vector.load %arg3[%157, %c0_72] : memref<128x128xf32, #tpu.memory_space<vmem>>, vector<1x128xf32>
    %c8_i32_73 = arith.constant 8 : i32
    %159 = arith.muli %122, %c8_i32_73 : i32
    %c6_i32_74 = arith.constant 6 : i32
    %160 = arith.addi %159, %c6_i32_74 : i32
    %161 = arith.index_cast %160 : i32 to index
    %162 = memref.load %arg1[%161] : memref<64xi32, #tpu.memory_space<smem>>
    %163 = arith.index_cast %162 : i32 to index
    %c0_75 = arith.constant 0 : index
    %164 = vector.load %arg3[%163, %c0_75] : memref<128x128xf32, #tpu.memory_space<vmem>>, vector<1x128xf32>
    %c8_i32_76 = arith.constant 8 : i32
    %165 = arith.muli %122, %c8_i32_76 : i32
    %c7_i32_77 = arith.constant 7 : i32
    %166 = arith.addi %165, %c7_i32_77 : i32
    %167 = arith.index_cast %166 : i32 to index
    %168 = memref.load %arg1[%167] : memref<64xi32, #tpu.memory_space<smem>>
    %169 = arith.index_cast %168 : i32 to index
    %c0_78 = arith.constant 0 : index
    %170 = vector.load %arg3[%169, %c0_78] : memref<128x128xf32, #tpu.memory_space<vmem>>, vector<1x128xf32>
    %171 = tpu.concatenate %128, %134, %140, %146, %152, %158, %164, %170 in 0 : vector<1x128xf32>, vector<1x128xf32>, vector<1x128xf32>, vector<1x128xf32>, vector<1x128xf32>, vector<1x128xf32>, vector<1x128xf32>, vector<1x128xf32> -> vector<8x128xf32>
    %cst_79 = arith.constant dense<0.000000e+00> : vector<8x128xf32>
    %172 = tpu.matmul %116, %3, %cst_79 {dimension_numbers = #tpu.dot_dimension_numbers<[1], [0], [0], [1], [0, 0, 1, 1], [], []>} : vector<8x128xf32>, vector<128x128xf32>, vector<8x128xf32> -> vector<8x128xf32>
    %173 = arith.addf %171, %172 : vector<8x128xf32>
    %174 = math.tanh %173 : vector<8x128xf32>
    %175 = arith.index_cast %c2_i32_53 : i32 to index
    %c0_80 = arith.constant 0 : index
    %c0_81 = arith.constant 0 : index
    %176 = vector.load %arg10[%175, %c0_80, %c0_81] : memref<8x8x128xf32, #tpu.memory_space<vmem>>, vector<1x8x128xf32>
    %177 = vector.shape_cast %176 : vector<1x8x128xf32> to vector<8x128xf32>
    %178 = vector.shape_cast %174 : vector<8x128xf32> to vector<1x8x128xf32>
    tpu.vector_store %arg10[%175, %c0_80, %c0_81], %178 {strides = array<i32>} : memref<8x8x128xf32, #tpu.memory_space<vmem>>, vector<1x8x128xf32>,
    %c3_i32_82 = arith.constant 3 : i32
    %c8_i32_83 = arith.constant 8 : i32
    %179 = arith.muli %arg0, %c8_i32_83 : i32
    %180 = arith.addi %179, %c3_i32_82 : i32
    %c8_i32_84 = arith.constant 8 : i32
    %181 = arith.muli %180, %c8_i32_84 : i32
    %c0_i32_85 = arith.constant 0 : i32
    %182 = arith.addi %181, %c0_i32_85 : i32
    %183 = arith.index_cast %182 : i32 to index
    %184 = memref.load %arg1[%183] : memref<64xi32, #tpu.memory_space<smem>>
    %185 = arith.index_cast %184 : i32 to index
    %c0_86 = arith.constant 0 : index
    %186 = vector.load %arg3[%185, %c0_86] : memref<128x128xf32, #tpu.memory_space<vmem>>, vector<1x128xf32>
    %c8_i32_87 = arith.constant 8 : i32
    %187 = arith.muli %180, %c8_i32_87 : i32
    %c1_i32_88 = arith.constant 1 : i32
    %188 = arith.addi %187, %c1_i32_88 : i32
    %189 = arith.index_cast %188 : i32 to index
    %190 = memref.load %arg1[%189] : memref<64xi32, #tpu.memory_space<smem>>
    %191 = arith.index_cast %190 : i32 to index
    %c0_89 = arith.constant 0 : index
    %192 = vector.load %arg3[%191, %c0_89] : memref<128x128xf32, #tpu.memory_space<vmem>>, vector<1x128xf32>
    %c8_i32_90 = arith.constant 8 : i32
    %193 = arith.muli %180, %c8_i32_90 : i32
    %c2_i32_91 = arith.constant 2 : i32
    %194 = arith.addi %193, %c2_i32_91 : i32
    %195 = arith.index_cast %194 : i32 to index
    %196 = memref.load %arg1[%195] : memref<64xi32, #tpu.memory_space<smem>>
    %197 = arith.index_cast %196 : i32 to index
    %c0_92 = arith.constant 0 : index
    %198 = vector.load %arg3[%197, %c0_92] : memref<128x128xf32, #tpu.memory_space<vmem>>, vector<1x128xf32>
    %c8_i32_93 = arith.constant 8 : i32
    %199 = arith.muli %180, %c8_i32_93 : i32
    %c3_i32_94 = arith.constant 3 : i32
    %200 = arith.addi %199, %c3_i32_94 : i32
    %201 = arith.index_cast %200 : i32 to index
    %202 = memref.load %arg1[%201] : memref<64xi32, #tpu.memory_space<smem>>
    %203 = arith.index_cast %202 : i32 to index
    %c0_95 = arith.constant 0 : index
    %204 = vector.load %arg3[%203, %c0_95] : memref<128x128xf32, #tpu.memory_space<vmem>>, vector<1x128xf32>
    %c8_i32_96 = arith.constant 8 : i32
    %205 = arith.muli %180, %c8_i32_96 : i32
    %c4_i32_97 = arith.constant 4 : i32
    %206 = arith.addi %205, %c4_i32_97 : i32
    %207 = arith.index_cast %206 : i32 to index
    %208 = memref.load %arg1[%207] : memref<64xi32, #tpu.memory_space<smem>>
    %209 = arith.index_cast %208 : i32 to index
    %c0_98 = arith.constant 0 : index
    %210 = vector.load %arg3[%209, %c0_98] : memref<128x128xf32, #tpu.memory_space<vmem>>, vector<1x128xf32>
    %c8_i32_99 = arith.constant 8 : i32
    %211 = arith.muli %180, %c8_i32_99 : i32
    %c5_i32_100 = arith.constant 5 : i32
    %212 = arith.addi %211, %c5_i32_100 : i32
    %213 = arith.index_cast %212 : i32 to index
    %214 = memref.load %arg1[%213] : memref<64xi32, #tpu.memory_space<smem>>
    %215 = arith.index_cast %214 : i32 to index
    %c0_101 = arith.constant 0 : index
    %216 = vector.load %arg3[%215, %c0_101] : memref<128x128xf32, #tpu.memory_space<vmem>>, vector<1x128xf32>
    %c8_i32_102 = arith.constant 8 : i32
    %217 = arith.muli %180, %c8_i32_102 : i32
    %c6_i32_103 = arith.constant 6 : i32
    %218 = arith.addi %217, %c6_i32_103 : i32
    %219 = arith.index_cast %218 : i32 to index
    %220 = memref.load %arg1[%219] : memref<64xi32, #tpu.memory_space<smem>>
    %221 = arith.index_cast %220 : i32 to index
    %c0_104 = arith.constant 0 : index
    %222 = vector.load %arg3[%221, %c0_104] : memref<128x128xf32, #tpu.memory_space<vmem>>, vector<1x128xf32>
    %c8_i32_105 = arith.constant 8 : i32
    %223 = arith.muli %180, %c8_i32_105 : i32
    %c7_i32_106 = arith.constant 7 : i32
    %224 = arith.addi %223, %c7_i32_106 : i32
    %225 = arith.index_cast %224 : i32 to index
    %226 = memref.load %arg1[%225] : memref<64xi32, #tpu.memory_space<smem>>
    %227 = arith.index_cast %226 : i32 to index
    %c0_107 = arith.constant 0 : index
    %228 = vector.load %arg3[%227, %c0_107] : memref<128x128xf32, #tpu.memory_space<vmem>>, vector<1x128xf32>
    %229 = tpu.concatenate %186, %192, %198, %204, %210, %216, %222, %228 in 0 : vector<1x128xf32>, vector<1x128xf32>, vector<1x128xf32>, vector<1x128xf32>, vector<1x128xf32>, vector<1x128xf32>, vector<1x128xf32>, vector<1x128xf32> -> vector<8x128xf32>
    %cst_108 = arith.constant dense<0.000000e+00> : vector<8x128xf32>
    %230 = tpu.matmul %174, %3, %cst_108 {dimension_numbers = #tpu.dot_dimension_numbers<[1], [0], [0], [1], [0, 0, 1, 1], [], []>} : vector<8x128xf32>, vector<128x128xf32>, vector<8x128xf32> -> vector<8x128xf32>
    %231 = arith.addf %229, %230 : vector<8x128xf32>
    %232 = math.tanh %231 : vector<8x128xf32>
    %233 = arith.index_cast %c3_i32_82 : i32 to index
    %c0_109 = arith.constant 0 : index
    %c0_110 = arith.constant 0 : index
    %234 = vector.load %arg10[%233, %c0_109, %c0_110] : memref<8x8x128xf32, #tpu.memory_space<vmem>>, vector<1x8x128xf32>
    %235 = vector.shape_cast %234 : vector<1x8x128xf32> to vector<8x128xf32>
    %236 = vector.shape_cast %232 : vector<8x128xf32> to vector<1x8x128xf32>
    tpu.vector_store %arg10[%233, %c0_109, %c0_110], %236 {strides = array<i32>} : memref<8x8x128xf32, #tpu.memory_space<vmem>>, vector<1x8x128xf32>,
    %c4_i32_111 = arith.constant 4 : i32
    %c8_i32_112 = arith.constant 8 : i32
    %237 = arith.muli %arg0, %c8_i32_112 : i32
    %238 = arith.addi %237, %c4_i32_111 : i32
    %c8_i32_113 = arith.constant 8 : i32
    %239 = arith.muli %238, %c8_i32_113 : i32
    %c0_i32_114 = arith.constant 0 : i32
    %240 = arith.addi %239, %c0_i32_114 : i32
    %241 = arith.index_cast %240 : i32 to index
    %242 = memref.load %arg1[%241] : memref<64xi32, #tpu.memory_space<smem>>
    %243 = arith.index_cast %242 : i32 to index
    %c0_115 = arith.constant 0 : index
    %244 = vector.load %arg3[%243, %c0_115] : memref<128x128xf32, #tpu.memory_space<vmem>>, vector<1x128xf32>
    %c8_i32_116 = arith.constant 8 : i32
    %245 = arith.muli %238, %c8_i32_116 : i32
    %c1_i32_117 = arith.constant 1 : i32
    %246 = arith.addi %245, %c1_i32_117 : i32
    %247 = arith.index_cast %246 : i32 to index
    %248 = memref.load %arg1[%247] : memref<64xi32, #tpu.memory_space<smem>>
    %249 = arith.index_cast %248 : i32 to index
    %c0_118 = arith.constant 0 : index
    %250 = vector.load %arg3[%249, %c0_118] : memref<128x128xf32, #tpu.memory_space<vmem>>, vector<1x128xf32>
    %c8_i32_119 = arith.constant 8 : i32
    %251 = arith.muli %238, %c8_i32_119 : i32
    %c2_i32_120 = arith.constant 2 : i32
    %252 = arith.addi %251, %c2_i32_120 : i32
    %253 = arith.index_cast %252 : i32 to index
    %254 = memref.load %arg1[%253] : memref<64xi32, #tpu.memory_space<smem>>
    %255 = arith.index_cast %254 : i32 to index
    %c0_121 = arith.constant 0 : index
    %256 = vector.load %arg3[%255, %c0_121] : memref<128x128xf32, #tpu.memory_space<vmem>>, vector<1x128xf32>
    %c8_i32_122 = arith.constant 8 : i32
    %257 = arith.muli %238, %c8_i32_122 : i32
    %c3_i32_123 = arith.constant 3 : i32
    %258 = arith.addi %257, %c3_i32_123 : i32
    %259 = arith.index_cast %258 : i32 to index
    %260 = memref.load %arg1[%259] : memref<64xi32, #tpu.memory_space<smem>>
    %261 = arith.index_cast %260 : i32 to index
    %c0_124 = arith.constant 0 : index
    %262 = vector.load %arg3[%261, %c0_124] : memref<128x128xf32, #tpu.memory_space<vmem>>, vector<1x128xf32>
    %c8_i32_125 = arith.constant 8 : i32
    %263 = arith.muli %238, %c8_i32_125 : i32
    %c4_i32_126 = arith.constant 4 : i32
    %264 = arith.addi %263, %c4_i32_126 : i32
    %265 = arith.index_cast %264 : i32 to index
    %266 = memref.load %arg1[%265] : memref<64xi32, #tpu.memory_space<smem>>
    %267 = arith.index_cast %266 : i32 to index
    %c0_127 = arith.constant 0 : index
    %268 = vector.load %arg3[%267, %c0_127] : memref<128x128xf32, #tpu.memory_space<vmem>>, vector<1x128xf32>
    %c8_i32_128 = arith.constant 8 : i32
    %269 = arith.muli %238, %c8_i32_128 : i32
    %c5_i32_129 = arith.constant 5 : i32
    %270 = arith.addi %269, %c5_i32_129 : i32
    %271 = arith.index_cast %270 : i32 to index
    %272 = memref.load %arg1[%271] : memref<64xi32, #tpu.memory_space<smem>>
    %273 = arith.index_cast %272 : i32 to index
    %c0_130 = arith.constant 0 : index
    %274 = vector.load %arg3[%273, %c0_130] : memref<128x128xf32, #tpu.memory_space<vmem>>, vector<1x128xf32>
    %c8_i32_131 = arith.constant 8 : i32
    %275 = arith.muli %238, %c8_i32_131 : i32
    %c6_i32_132 = arith.constant 6 : i32
    %276 = arith.addi %275, %c6_i32_132 : i32
    %277 = arith.index_cast %276 : i32 to index
    %278 = memref.load %arg1[%277] : memref<64xi32, #tpu.memory_space<smem>>
    %279 = arith.index_cast %278 : i32 to index
    %c0_133 = arith.constant 0 : index
    %280 = vector.load %arg3[%279, %c0_133] : memref<128x128xf32, #tpu.memory_space<vmem>>, vector<1x128xf32>
    %c8_i32_134 = arith.constant 8 : i32
    %281 = arith.muli %238, %c8_i32_134 : i32
    %c7_i32_135 = arith.constant 7 : i32
    %282 = arith.addi %281, %c7_i32_135 : i32
    %283 = arith.index_cast %282 : i32 to index
    %284 = memref.load %arg1[%283] : memref<64xi32, #tpu.memory_space<smem>>
    %285 = arith.index_cast %284 : i32 to index
    %c0_136 = arith.constant 0 : index
    %286 = vector.load %arg3[%285, %c0_136] : memref<128x128xf32, #tpu.memory_space<vmem>>, vector<1x128xf32>
    %287 = tpu.concatenate %244, %250, %256, %262, %268, %274, %280, %286 in 0 : vector<1x128xf32>, vector<1x128xf32>, vector<1x128xf32>, vector<1x128xf32>, vector<1x128xf32>, vector<1x128xf32>, vector<1x128xf32>, vector<1x128xf32> -> vector<8x128xf32>
    %cst_137 = arith.constant dense<0.000000e+00> : vector<8x128xf32>
    %288 = tpu.matmul %232, %3, %cst_137 {dimension_numbers = #tpu.dot_dimension_numbers<[1], [0], [0], [1], [0, 0, 1, 1], [], []>} : vector<8x128xf32>, vector<128x128xf32>, vector<8x128xf32> -> vector<8x128xf32>
    %289 = arith.addf %287, %288 : vector<8x128xf32>
    %290 = math.tanh %289 : vector<8x128xf32>
    %291 = arith.index_cast %c4_i32_111 : i32 to index
    %c0_138 = arith.constant 0 : index
    %c0_139 = arith.constant 0 : index
    %292 = vector.load %arg10[%291, %c0_138, %c0_139] : memref<8x8x128xf32, #tpu.memory_space<vmem>>, vector<1x8x128xf32>
    %293 = vector.shape_cast %292 : vector<1x8x128xf32> to vector<8x128xf32>
    %294 = vector.shape_cast %290 : vector<8x128xf32> to vector<1x8x128xf32>
    tpu.vector_store %arg10[%291, %c0_138, %c0_139], %294 {strides = array<i32>} : memref<8x8x128xf32, #tpu.memory_space<vmem>>, vector<1x8x128xf32>,
    %c5_i32_140 = arith.constant 5 : i32
    %c8_i32_141 = arith.constant 8 : i32
    %295 = arith.muli %arg0, %c8_i32_141 : i32
    %296 = arith.addi %295, %c5_i32_140 : i32
    %c8_i32_142 = arith.constant 8 : i32
    %297 = arith.muli %296, %c8_i32_142 : i32
    %c0_i32_143 = arith.constant 0 : i32
    %298 = arith.addi %297, %c0_i32_143 : i32
    %299 = arith.index_cast %298 : i32 to index
    %300 = memref.load %arg1[%299] : memref<64xi32, #tpu.memory_space<smem>>
    %301 = arith.index_cast %300 : i32 to index
    %c0_144 = arith.constant 0 : index
    %302 = vector.load %arg3[%301, %c0_144] : memref<128x128xf32, #tpu.memory_space<vmem>>, vector<1x128xf32>
    %c8_i32_145 = arith.constant 8 : i32
    %303 = arith.muli %296, %c8_i32_145 : i32
    %c1_i32_146 = arith.constant 1 : i32
    %304 = arith.addi %303, %c1_i32_146 : i32
    %305 = arith.index_cast %304 : i32 to index
    %306 = memref.load %arg1[%305] : memref<64xi32, #tpu.memory_space<smem>>
    %307 = arith.index_cast %306 : i32 to index
    %c0_147 = arith.constant 0 : index
    %308 = vector.load %arg3[%307, %c0_147] : memref<128x128xf32, #tpu.memory_space<vmem>>, vector<1x128xf32>
    %c8_i32_148 = arith.constant 8 : i32
    %309 = arith.muli %296, %c8_i32_148 : i32
    %c2_i32_149 = arith.constant 2 : i32
    %310 = arith.addi %309, %c2_i32_149 : i32
    %311 = arith.index_cast %310 : i32 to index
    %312 = memref.load %arg1[%311] : memref<64xi32, #tpu.memory_space<smem>>
    %313 = arith.index_cast %312 : i32 to index
    %c0_150 = arith.constant 0 : index
    %314 = vector.load %arg3[%313, %c0_150] : memref<128x128xf32, #tpu.memory_space<vmem>>, vector<1x128xf32>
    %c8_i32_151 = arith.constant 8 : i32
    %315 = arith.muli %296, %c8_i32_151 : i32
    %c3_i32_152 = arith.constant 3 : i32
    %316 = arith.addi %315, %c3_i32_152 : i32
    %317 = arith.index_cast %316 : i32 to index
    %318 = memref.load %arg1[%317] : memref<64xi32, #tpu.memory_space<smem>>
    %319 = arith.index_cast %318 : i32 to index
    %c0_153 = arith.constant 0 : index
    %320 = vector.load %arg3[%319, %c0_153] : memref<128x128xf32, #tpu.memory_space<vmem>>, vector<1x128xf32>
    %c8_i32_154 = arith.constant 8 : i32
    %321 = arith.muli %296, %c8_i32_154 : i32
    %c4_i32_155 = arith.constant 4 : i32
    %322 = arith.addi %321, %c4_i32_155 : i32
    %323 = arith.index_cast %322 : i32 to index
    %324 = memref.load %arg1[%323] : memref<64xi32, #tpu.memory_space<smem>>
    %325 = arith.index_cast %324 : i32 to index
    %c0_156 = arith.constant 0 : index
    %326 = vector.load %arg3[%325, %c0_156] : memref<128x128xf32, #tpu.memory_space<vmem>>, vector<1x128xf32>
    %c8_i32_157 = arith.constant 8 : i32
    %327 = arith.muli %296, %c8_i32_157 : i32
    %c5_i32_158 = arith.constant 5 : i32
    %328 = arith.addi %327, %c5_i32_158 : i32
    %329 = arith.index_cast %328 : i32 to index
    %330 = memref.load %arg1[%329] : memref<64xi32, #tpu.memory_space<smem>>
    %331 = arith.index_cast %330 : i32 to index
    %c0_159 = arith.constant 0 : index
    %332 = vector.load %arg3[%331, %c0_159] : memref<128x128xf32, #tpu.memory_space<vmem>>, vector<1x128xf32>
    %c8_i32_160 = arith.constant 8 : i32
    %333 = arith.muli %296, %c8_i32_160 : i32
    %c6_i32_161 = arith.constant 6 : i32
    %334 = arith.addi %333, %c6_i32_161 : i32
    %335 = arith.index_cast %334 : i32 to index
    %336 = memref.load %arg1[%335] : memref<64xi32, #tpu.memory_space<smem>>
    %337 = arith.index_cast %336 : i32 to index
    %c0_162 = arith.constant 0 : index
    %338 = vector.load %arg3[%337, %c0_162] : memref<128x128xf32, #tpu.memory_space<vmem>>, vector<1x128xf32>
    %c8_i32_163 = arith.constant 8 : i32
    %339 = arith.muli %296, %c8_i32_163 : i32
    %c7_i32_164 = arith.constant 7 : i32
    %340 = arith.addi %339, %c7_i32_164 : i32
    %341 = arith.index_cast %340 : i32 to index
    %342 = memref.load %arg1[%341] : memref<64xi32, #tpu.memory_space<smem>>
    %343 = arith.index_cast %342 : i32 to index
    %c0_165 = arith.constant 0 : index
    %344 = vector.load %arg3[%343, %c0_165] : memref<128x128xf32, #tpu.memory_space<vmem>>, vector<1x128xf32>
    %345 = tpu.concatenate %302, %308, %314, %320, %326, %332, %338, %344 in 0 : vector<1x128xf32>, vector<1x128xf32>, vector<1x128xf32>, vector<1x128xf32>, vector<1x128xf32>, vector<1x128xf32>, vector<1x128xf32>, vector<1x128xf32> -> vector<8x128xf32>
    %cst_166 = arith.constant dense<0.000000e+00> : vector<8x128xf32>
    %346 = tpu.matmul %290, %3, %cst_166 {dimension_numbers = #tpu.dot_dimension_numbers<[1], [0], [0], [1], [0, 0, 1, 1], [], []>} : vector<8x128xf32>, vector<128x128xf32>, vector<8x128xf32> -> vector<8x128xf32>
    %347 = arith.addf %345, %346 : vector<8x128xf32>
    %348 = math.tanh %347 : vector<8x128xf32>
    %349 = arith.index_cast %c5_i32_140 : i32 to index
    %c0_167 = arith.constant 0 : index
    %c0_168 = arith.constant 0 : index
    %350 = vector.load %arg10[%349, %c0_167, %c0_168] : memref<8x8x128xf32, #tpu.memory_space<vmem>>, vector<1x8x128xf32>
    %351 = vector.shape_cast %350 : vector<1x8x128xf32> to vector<8x128xf32>
    %352 = vector.shape_cast %348 : vector<8x128xf32> to vector<1x8x128xf32>
    tpu.vector_store %arg10[%349, %c0_167, %c0_168], %352 {strides = array<i32>} : memref<8x8x128xf32, #tpu.memory_space<vmem>>, vector<1x8x128xf32>,
    %c6_i32_169 = arith.constant 6 : i32
    %c8_i32_170 = arith.constant 8 : i32
    %353 = arith.muli %arg0, %c8_i32_170 : i32
    %354 = arith.addi %353, %c6_i32_169 : i32
    %c8_i32_171 = arith.constant 8 : i32
    %355 = arith.muli %354, %c8_i32_171 : i32
    %c0_i32_172 = arith.constant 0 : i32
    %356 = arith.addi %355, %c0_i32_172 : i32
    %357 = arith.index_cast %356 : i32 to index
    %358 = memref.load %arg1[%357] : memref<64xi32, #tpu.memory_space<smem>>
    %359 = arith.index_cast %358 : i32 to index
    %c0_173 = arith.constant 0 : index
    %360 = vector.load %arg3[%359, %c0_173] : memref<128x128xf32, #tpu.memory_space<vmem>>, vector<1x128xf32>
    %c8_i32_174 = arith.constant 8 : i32
    %361 = arith.muli %354, %c8_i32_174 : i32
    %c1_i32_175 = arith.constant 1 : i32
    %362 = arith.addi %361, %c1_i32_175 : i32
    %363 = arith.index_cast %362 : i32 to index
    %364 = memref.load %arg1[%363] : memref<64xi32, #tpu.memory_space<smem>>
    %365 = arith.index_cast %364 : i32 to index
    %c0_176 = arith.constant 0 : index
    %366 = vector.load %arg3[%365, %c0_176] : memref<128x128xf32, #tpu.memory_space<vmem>>, vector<1x128xf32>
    %c8_i32_177 = arith.constant 8 : i32
    %367 = arith.muli %354, %c8_i32_177 : i32
    %c2_i32_178 = arith.constant 2 : i32
    %368 = arith.addi %367, %c2_i32_178 : i32
    %369 = arith.index_cast %368 : i32 to index
    %370 = memref.load %arg1[%369] : memref<64xi32, #tpu.memory_space<smem>>
    %371 = arith.index_cast %370 : i32 to index
    %c0_179 = arith.constant 0 : index
    %372 = vector.load %arg3[%371, %c0_179] : memref<128x128xf32, #tpu.memory_space<vmem>>, vector<1x128xf32>
    %c8_i32_180 = arith.constant 8 : i32
    %373 = arith.muli %354, %c8_i32_180 : i32
    %c3_i32_181 = arith.constant 3 : i32
    %374 = arith.addi %373, %c3_i32_181 : i32
    %375 = arith.index_cast %374 : i32 to index
    %376 = memref.load %arg1[%375] : memref<64xi32, #tpu.memory_space<smem>>
    %377 = arith.index_cast %376 : i32 to index
    %c0_182 = arith.constant 0 : index
    %378 = vector.load %arg3[%377, %c0_182] : memref<128x128xf32, #tpu.memory_space<vmem>>, vector<1x128xf32>
    %c8_i32_183 = arith.constant 8 : i32
    %379 = arith.muli %354, %c8_i32_183 : i32
    %c4_i32_184 = arith.constant 4 : i32
    %380 = arith.addi %379, %c4_i32_184 : i32
    %381 = arith.index_cast %380 : i32 to index
    %382 = memref.load %arg1[%381] : memref<64xi32, #tpu.memory_space<smem>>
    %383 = arith.index_cast %382 : i32 to index
    %c0_185 = arith.constant 0 : index
    %384 = vector.load %arg3[%383, %c0_185] : memref<128x128xf32, #tpu.memory_space<vmem>>, vector<1x128xf32>
    %c8_i32_186 = arith.constant 8 : i32
    %385 = arith.muli %354, %c8_i32_186 : i32
    %c5_i32_187 = arith.constant 5 : i32
    %386 = arith.addi %385, %c5_i32_187 : i32
    %387 = arith.index_cast %386 : i32 to index
    %388 = memref.load %arg1[%387] : memref<64xi32, #tpu.memory_space<smem>>
    %389 = arith.index_cast %388 : i32 to index
    %c0_188 = arith.constant 0 : index
    %390 = vector.load %arg3[%389, %c0_188] : memref<128x128xf32, #tpu.memory_space<vmem>>, vector<1x128xf32>
    %c8_i32_189 = arith.constant 8 : i32
    %391 = arith.muli %354, %c8_i32_189 : i32
    %c6_i32_190 = arith.constant 6 : i32
    %392 = arith.addi %391, %c6_i32_190 : i32
    %393 = arith.index_cast %392 : i32 to index
    %394 = memref.load %arg1[%393] : memref<64xi32, #tpu.memory_space<smem>>
    %395 = arith.index_cast %394 : i32 to index
    %c0_191 = arith.constant 0 : index
    %396 = vector.load %arg3[%395, %c0_191] : memref<128x128xf32, #tpu.memory_space<vmem>>, vector<1x128xf32>
    %c8_i32_192 = arith.constant 8 : i32
    %397 = arith.muli %354, %c8_i32_192 : i32
    %c7_i32_193 = arith.constant 7 : i32
    %398 = arith.addi %397, %c7_i32_193 : i32
    %399 = arith.index_cast %398 : i32 to index
    %400 = memref.load %arg1[%399] : memref<64xi32, #tpu.memory_space<smem>>
    %401 = arith.index_cast %400 : i32 to index
    %c0_194 = arith.constant 0 : index
    %402 = vector.load %arg3[%401, %c0_194] : memref<128x128xf32, #tpu.memory_space<vmem>>, vector<1x128xf32>
    %403 = tpu.concatenate %360, %366, %372, %378, %384, %390, %396, %402 in 0 : vector<1x128xf32>, vector<1x128xf32>, vector<1x128xf32>, vector<1x128xf32>, vector<1x128xf32>, vector<1x128xf32>, vector<1x128xf32>, vector<1x128xf32> -> vector<8x128xf32>
    %cst_195 = arith.constant dense<0.000000e+00> : vector<8x128xf32>
    %404 = tpu.matmul %348, %3, %cst_195 {dimension_numbers = #tpu.dot_dimension_numbers<[1], [0], [0], [1], [0, 0, 1, 1], [], []>} : vector<8x128xf32>, vector<128x128xf32>, vector<8x128xf32> -> vector<8x128xf32>
    %405 = arith.addf %403, %404 : vector<8x128xf32>
    %406 = math.tanh %405 : vector<8x128xf32>
    %407 = arith.index_cast %c6_i32_169 : i32 to index
    %c0_196 = arith.constant 0 : index
    %c0_197 = arith.constant 0 : index
    %408 = vector.load %arg10[%407, %c0_196, %c0_197] : memref<8x8x128xf32, #tpu.memory_space<vmem>>, vector<1x8x128xf32>
    %409 = vector.shape_cast %408 : vector<1x8x128xf32> to vector<8x128xf32>
    %410 = vector.shape_cast %406 : vector<8x128xf32> to vector<1x8x128xf32>
    tpu.vector_store %arg10[%407, %c0_196, %c0_197], %410 {strides = array<i32>} : memref<8x8x128xf32, #tpu.memory_space<vmem>>, vector<1x8x128xf32>,
    %c7_i32_198 = arith.constant 7 : i32
    %c8_i32_199 = arith.constant 8 : i32
    %411 = arith.muli %arg0, %c8_i32_199 : i32
    %412 = arith.addi %411, %c7_i32_198 : i32
    %c8_i32_200 = arith.constant 8 : i32
    %413 = arith.muli %412, %c8_i32_200 : i32
    %c0_i32_201 = arith.constant 0 : i32
    %414 = arith.addi %413, %c0_i32_201 : i32
    %415 = arith.index_cast %414 : i32 to index
    %416 = memref.load %arg1[%415] : memref<64xi32, #tpu.memory_space<smem>>
    %417 = arith.index_cast %416 : i32 to index
    %c0_202 = arith.constant 0 : index
    %418 = vector.load %arg3[%417, %c0_202] : memref<128x128xf32, #tpu.memory_space<vmem>>, vector<1x128xf32>
    %c8_i32_203 = arith.constant 8 : i32
    %419 = arith.muli %412, %c8_i32_203 : i32
    %c1_i32_204 = arith.constant 1 : i32
    %420 = arith.addi %419, %c1_i32_204 : i32
    %421 = arith.index_cast %420 : i32 to index
    %422 = memref.load %arg1[%421] : memref<64xi32, #tpu.memory_space<smem>>
    %423 = arith.index_cast %422 : i32 to index
    %c0_205 = arith.constant 0 : index
    %424 = vector.load %arg3[%423, %c0_205] : memref<128x128xf32, #tpu.memory_space<vmem>>, vector<1x128xf32>
    %c8_i32_206 = arith.constant 8 : i32
    %425 = arith.muli %412, %c8_i32_206 : i32
    %c2_i32_207 = arith.constant 2 : i32
    %426 = arith.addi %425, %c2_i32_207 : i32
    %427 = arith.index_cast %426 : i32 to index
    %428 = memref.load %arg1[%427] : memref<64xi32, #tpu.memory_space<smem>>
    %429 = arith.index_cast %428 : i32 to index
    %c0_208 = arith.constant 0 : index
    %430 = vector.load %arg3[%429, %c0_208] : memref<128x128xf32, #tpu.memory_space<vmem>>, vector<1x128xf32>
    %c8_i32_209 = arith.constant 8 : i32
    %431 = arith.muli %412, %c8_i32_209 : i32
    %c3_i32_210 = arith.constant 3 : i32
    %432 = arith.addi %431, %c3_i32_210 : i32
    %433 = arith.index_cast %432 : i32 to index
    %434 = memref.load %arg1[%433] : memref<64xi32, #tpu.memory_space<smem>>
    %435 = arith.index_cast %434 : i32 to index
    %c0_211 = arith.constant 0 : index
    %436 = vector.load %arg3[%435, %c0_211] : memref<128x128xf32, #tpu.memory_space<vmem>>, vector<1x128xf32>
    %c8_i32_212 = arith.constant 8 : i32
    %437 = arith.muli %412, %c8_i32_212 : i32
    %c4_i32_213 = arith.constant 4 : i32
    %438 = arith.addi %437, %c4_i32_213 : i32
    %439 = arith.index_cast %438 : i32 to index
    %440 = memref.load %arg1[%439] : memref<64xi32, #tpu.memory_space<smem>>
    %441 = arith.index_cast %440 : i32 to index
    %c0_214 = arith.constant 0 : index
    %442 = vector.load %arg3[%441, %c0_214] : memref<128x128xf32, #tpu.memory_space<vmem>>, vector<1x128xf32>
    %c8_i32_215 = arith.constant 8 : i32
    %443 = arith.muli %412, %c8_i32_215 : i32
    %c5_i32_216 = arith.constant 5 : i32
    %444 = arith.addi %443, %c5_i32_216 : i32
    %445 = arith.index_cast %444 : i32 to index
    %446 = memref.load %arg1[%445] : memref<64xi32, #tpu.memory_space<smem>>
    %447 = arith.index_cast %446 : i32 to index
    %c0_217 = arith.constant 0 : index
    %448 = vector.load %arg3[%447, %c0_217] : memref<128x128xf32, #tpu.memory_space<vmem>>, vector<1x128xf32>
    %c8_i32_218 = arith.constant 8 : i32
    %449 = arith.muli %412, %c8_i32_218 : i32
    %c6_i32_219 = arith.constant 6 : i32
    %450 = arith.addi %449, %c6_i32_219 : i32
    %451 = arith.index_cast %450 : i32 to index
    %452 = memref.load %arg1[%451] : memref<64xi32, #tpu.memory_space<smem>>
    %453 = arith.index_cast %452 : i32 to index
    %c0_220 = arith.constant 0 : index
    %454 = vector.load %arg3[%453, %c0_220] : memref<128x128xf32, #tpu.memory_space<vmem>>, vector<1x128xf32>
    %c8_i32_221 = arith.constant 8 : i32
    %455 = arith.muli %412, %c8_i32_221 : i32
    %c7_i32_222 = arith.constant 7 : i32
    %456 = arith.addi %455, %c7_i32_222 : i32
    %457 = arith.index_cast %456 : i32 to index
    %458 = memref.load %arg1[%457] : memref<64xi32, #tpu.memory_space<smem>>
    %459 = arith.index_cast %458 : i32 to index
    %c0_223 = arith.constant 0 : index
    %460 = vector.load %arg3[%459, %c0_223] : memref<128x128xf32, #tpu.memory_space<vmem>>, vector<1x128xf32>
    %461 = tpu.concatenate %418, %424, %430, %436, %442, %448, %454, %460 in 0 : vector<1x128xf32>, vector<1x128xf32>, vector<1x128xf32>, vector<1x128xf32>, vector<1x128xf32>, vector<1x128xf32>, vector<1x128xf32>, vector<1x128xf32> -> vector<8x128xf32>
    %cst_224 = arith.constant dense<0.000000e+00> : vector<8x128xf32>
    %462 = tpu.matmul %406, %3, %cst_224 {dimension_numbers = #tpu.dot_dimension_numbers<[1], [0], [0], [1], [0, 0, 1, 1], [], []>} : vector<8x128xf32>, vector<128x128xf32>, vector<8x128xf32> -> vector<8x128xf32>
    %463 = arith.addf %461, %462 : vector<8x128xf32>
    %464 = math.tanh %463 : vector<8x128xf32>
    %465 = arith.index_cast %c7_i32_198 : i32 to index
    %c0_225 = arith.constant 0 : index
    %c0_226 = arith.constant 0 : index
    %466 = vector.load %arg10[%465, %c0_225, %c0_226] : memref<8x8x128xf32, #tpu.memory_space<vmem>>, vector<1x8x128xf32>
    %467 = vector.shape_cast %466 : vector<1x8x128xf32> to vector<8x128xf32>
    %468 = vector.shape_cast %464 : vector<8x128xf32> to vector<1x8x128xf32>
    tpu.vector_store %arg10[%465, %c0_225, %c0_226], %468 {strides = array<i32>} : memref<8x8x128xf32, #tpu.memory_space<vmem>>, vector<1x8x128xf32>,
    %c8_i32_227 = arith.constant 8 : i32
    %c0_228 = arith.constant 0 : index
    %c0_229 = arith.constant 0 : index
    %469 = vector.load %arg9[%c0_228, %c0_229] : memref<8x128xf32, #tpu.memory_space<vmem>>, vector<8x128xf32>
    tpu.vector_store %arg9[%c0_228, %c0_229], %464 {strides = array<i32>} : memref<8x128xf32, #tpu.memory_space<vmem>>, vector<8x128xf32>,
    %c0_230 = arith.constant 0 : index
    %c0_231 = arith.constant 0 : index
    %c0_232 = arith.constant 0 : index
    %470 = vector.load %arg10[%c0_230, %c0_231, %c0_232] : memref<8x8x128xf32, #tpu.memory_space<vmem>>, vector<8x8x128xf32>
    %471 = vector.shape_cast %470 : vector<8x8x128xf32> to vector<64x128xf32>
    %c0_233 = arith.constant 0 : index
    %c0_234 = arith.constant 0 : index
    %472 = vector.load %arg5[%c0_233, %c0_234] : memref<128x128xf32, #tpu.memory_space<vmem>>, vector<128x128xf32>
    %cst_235 = arith.constant dense<0.000000e+00> : vector<64x128xf32>
    %473 = tpu.matmul %471, %472, %cst_235 {dimension_numbers = #tpu.dot_dimension_numbers<[1], [0], [0], [1], [0, 0, 1, 1], [], []>} : vector<64x128xf32>, vector<128x128xf32>, vector<64x128xf32> -> vector<64x128xf32>
    %c0_236 = arith.constant 0 : index
    %c0_237 = arith.constant 0 : index
    %474 = vector.load %arg6[%c0_236, %c0_237] : memref<1x128xf32, #tpu.memory_space<vmem>>, vector<1x128xf32>
    %475 = vector.broadcast %474 : vector<1x128xf32> to vector<64x128xf32>
    %476 = arith.addf %473, %475 : vector<64x128xf32>
    %477 = vector.shape_cast %476 : vector<64x128xf32> to vector<8x8x128xf32>
    %c0_238 = arith.constant 0 : index
    %c0_239 = arith.constant 0 : index
    %c0_240 = arith.constant 0 : index
    %478 = vector.load %arg7[%c0_238, %c0_239, %c0_240] : memref<8x8x128xf32, #tpu.memory_space<vmem>>, vector<8x8x128xf32>
    tpu.vector_store %arg7[%c0_238, %c0_239, %c0_240], %477 {strides = array<i32>} : memref<8x8x128xf32, #tpu.memory_space<vmem>>, vector<8x8x128xf32>,
    %c0_i32_241 = arith.constant 0 : i32
    %479 = arith.cmpi eq, %arg0, %c0_i32_241 : i32
    %480 = arith.extui %479 : i1 to i32
    %c0_i32_242 = arith.constant 0 : i32
    %481 = arith.cmpi ne, %480, %c0_i32_242 : i32
    scf.if %481 {
      %c0_243 = arith.constant 0 : index
      %c0_244 = arith.constant 0 : index
      %c0_245 = arith.constant 0 : index
      %482 = vector.load %arg8[%c0_243, %c0_244, %c0_245] : memref<1x8x128xf32, #tpu.memory_space<vmem>>, vector<1x8x128xf32>
      %483 = vector.shape_cast %482 : vector<1x8x128xf32> to vector<8x128xf32>
      %484 = vector.shape_cast %464 : vector<8x128xf32> to vector<1x8x128xf32>
      tpu.vector_store %arg8[%c0_243, %c0_244, %c0_245], %484 {strides = array<i32>} : memref<1x8x128xf32, #tpu.memory_space<vmem>>, vector<1x8x128xf32>,
    } else {
    }
    return
  }
  func.func @transform_0(%arg0: i32, %arg1: memref<64xi32, #tpu.memory_space<smem>>) -> (i32, i32, i32) {
    %c0_i32 = arith.constant 0 : i32
    %c0_i32_0 = arith.constant 0 : i32
    %c0_i32_1 = arith.constant 0 : i32
    %c0_i32_2 = arith.constant 0 : i32
    return %c0_i32, %c0_i32_0, %c0_i32_1 : i32, i32, i32
  }
  func.func @transform_1(%arg0: i32, %arg1: memref<64xi32, #tpu.memory_space<smem>>) -> (i32, i32) {
    %c0_i32 = arith.constant 0 : i32
    %c0_i32_0 = arith.constant 0 : i32
    %c0_i32_1 = arith.constant 0 : i32
    return %c0_i32, %c0_i32_0 : i32, i32
  }
  func.func @transform_2(%arg0: i32, %arg1: memref<64xi32, #tpu.memory_space<smem>>) -> (i32, i32) {
    %c0_i32 = arith.constant 0 : i32
    %c0_i32_0 = arith.constant 0 : i32
    %c0_i32_1 = arith.constant 0 : i32
    return %c0_i32, %c0_i32_0 : i32, i32
  }
  func.func @transform_3(%arg0: i32, %arg1: memref<64xi32, #tpu.memory_space<smem>>) -> (i32, i32) {
    %c0_i32 = arith.constant 0 : i32
    %c0_i32_0 = arith.constant 0 : i32
    %c0_i32_1 = arith.constant 0 : i32
    return %c0_i32, %c0_i32_0 : i32, i32
  }
  func.func @transform_4(%arg0: i32, %arg1: memref<64xi32, #tpu.memory_space<smem>>) -> (i32, i32) {
    %c0_i32 = arith.constant 0 : i32
    %c0_i32_0 = arith.constant 0 : i32
    %c0_i32_1 = arith.constant 0 : i32
    return %c0_i32, %c0_i32_0 : i32, i32
  }
  func.func @transform_5(%arg0: i32, %arg1: memref<64xi32, #tpu.memory_space<smem>>) -> (i32, i32, i32) {
    %c0_i32 = arith.constant 0 : i32
    %c0_i32_0 = arith.constant 0 : i32
    %c0_i32_1 = arith.constant 0 : i32
    return %arg0, %c0_i32, %c0_i32_0 : i32, i32, i32
  }
  func.func @transform_6(%arg0: i32, %arg1: memref<64xi32, #tpu.memory_space<smem>>) -> (i32, i32, i32) {
    %c0_i32 = arith.constant 0 : i32
    %c0_i32_0 = arith.constant 0 : i32
    %c0_i32_1 = arith.constant 0 : i32
    %c0_i32_2 = arith.constant 0 : i32
    return %c0_i32, %c0_i32_0, %c0_i32_1 : i32, i32, i32
  }
}

</mosaic_0001>

<bundles_post_ra>
// kernel: tpu_custom_call.1
= control target key start
LH: loop header
LB: loop body
LE: loop exit
PB: predicated region body
PF: predicated region fallthrough
CT: control target
= control target key end

     0   :  { %s1243_s27 = smov [#allocation5]   ;;  %s1554_s0 = inlined_call_operand.hbm [shape: s32[64], index: 0, kind: input, shape index: {}]   ;;  %s1555_s1 = inlined_call_operand.hbm [shape: f32[1,8,128], index: 1, kind: input, shape index: {}]   ;;  %s1556_s2 = inlined_call_operand.hbm [shape: f32[128,128], index: 2, kind: input, shape index: {}]   ;;  %s1557_s3 = inlined_call_operand.hbm [shape: f32[128,128], index: 3, kind: input, shape index: {}]   ;;  %s1558_s4 = inlined_call_operand.hbm [shape: f32[128,128], index: 4, kind: input, shape index: {}]   ;;  %s1559_s5 = inlined_call_operand.vmem [shape: f32[1,128], index: 5, kind: input, shape index: {}]   ;;  %s1560_s6 = inlined_call_operand.hbm [shape: f32[8,8,128], index: 6, kind: output, shape index: {0}]   ;;  %s1561_s7 = inlined_call_operand.hbm [shape: f32[1,8,128], index: 7, kind: output, shape index: {1}]  }
   0x1   :  { %s14_s26 = sshll.u32 %s1554_s0, 4  ;;  %s15_s26 = int_to_ptr.hbm [resolvable:$true] %s14_s26 }
   0x2   :  { %17 = dma.hbm_to_smem %s15_s26, 16, %s1243_s27, [#allocation4] }
   0x3   :  { %1231 = dma.done.wait [#allocation4], 16 }
   0x4   :  { %1232 = vsyncadd [#allocation4], 4294967280 }
   0x5   :  { %20 = sfence }
   0x6   :  { %21 = vsyncpa [#allocation7], 0 }
   0x7   :  { %22 = vsyncpa [#allocation10], 0 }
   0x8   :  { %23 = vsyncpa [#allocation13], 0 }
   0x9   :  { %24 = vsyncpa [#allocation8], 0  ;;  %s41_s30 = sshll.u32 %s1556_s2, 4  ;;  %s42_s30 = int_to_ptr.hbm [resolvable:$true] %s41_s30 }
   0xa   :  { %25 = vsyncpa [#allocation16], 0  ;;  %s1244_s8 = smov [#allocation9]   ;;  %s31_s11 = sshll.u32 %s1555_s1, 4  ;;  %s32_s11 = int_to_ptr.hbm [resolvable:$true] %s31_s11 }
   0xb   :  { %s43_s9 = sshll.u32 %s1244_s8, 4  ;;  %s1245_s12 = smov 128   ;;  %s44_s9 = int_to_ptr.vmem [resolvable:$true] %s43_s9 }
   0xc   :  { %s1246_s13 = smov 8   ;;  %s1247_s14 = smov [#allocation6]  }
   0xd   :  { %49 = dma.hbm_to_vmem [thread:$0]  %s42_s30, 2048, %s44_s9, [#allocation10], %s1245_s12, %s1245_s12, %s1246_s13  }
   0xe   :  { %s33_s15 = sshll.u32 %s1247_s14, 4  ;;  %s54_s17 = sshll.u32 %s1557_s3, 4  ;;  %s34_s15 = int_to_ptr.vmem [resolvable:$true] %s33_s15  ;;  %s55_s17 = int_to_ptr.hbm [resolvable:$true] %s54_s17 }
   0xf   :  { %36 = dma.hbm_to_vmem [thread:$0]  %s32_s11, 128, %s34_s15, [#allocation7]  }
  0x10   :  { %s67_s1 = sshll.u32 %s1558_s4, 4  ;;  %s1248_s20 = smov [#allocation11]   ;;  %s68_s1 = int_to_ptr.hbm [resolvable:$true] %s67_s1 }
  0x11   :  { %s56_s21 = sshll.u32 %s1248_s20, 4  ;;  %s1249_s22 = smov [#allocation12]   ;;  %s57_s21 = int_to_ptr.vmem [resolvable:$true] %s56_s21 }
  0x12   :  { %62 = dma.hbm_to_vmem [thread:$0]  %s55_s17, 2048, %s57_s21, [#allocation10], %s1245_s12, %s1245_s12, %s1246_s13  }
  0x13   :  { %s69_s23 = sshll.u32 %s1249_s22, 4  ;;  %s70_s23 = int_to_ptr.vmem [resolvable:$true] %s69_s23 }
  0x14   :  { %75 = dma.hbm_to_vmem [thread:$0]  %s68_s1, 2048, %s70_s23, [#allocation13], %s1245_s12, %s1245_s12, %s1246_s13  }
  0x15   :  { %1233 = dma.done.wait [#allocation7], 128  }
  0x16   :  { %1234 = vsyncadd [#allocation7], 4294967168 }
  0x17   :  { %1235 = dma.done.wait [#allocation10], 4096  }
  0x18   :  { %1236 = vsyncadd [#allocation10], 4294963200 }
  0x19   :  { %1237 = dma.done.wait [#allocation13], 2048  }
  0x1a   :  { %1238 = vsyncadd [#allocation13], 4294965248  ;;  %v1316_v0 = vld [vmem:[#allocation11 + $0x78] sm:$0xff]  ;;  %v1318_v1 = vld [vmem:[#allocation11 + $0x70] sm:$0xff]  ;;  %s986_s3 = sld [smem:[#allocation5 + $0x1]]  ;;  %vm170_vm0 = vcmask 1040384  }
  0x1b   :  { %184 = vmatpush.msra.mxu1 %v1316_v0  ;;  %354 = vmatpush.msra.mxu2 %v1316_v0  ;;  %v1322_v2 = vld [vmem:[#allocation11 + $0x68] sm:$0xff]  ;;  %v1327_v3 = vld [vmem:[#allocation11 + $0x60] sm:$0xff]  ;;  %v827_v4 = vld [vmem:[#allocation12 + $0x78] sm:$0xff]  ;;  %s987_s4 = sld [smem:[#allocation5 + $0x2]]  ;;  %vm172_vm1 = vcmask 1041408   ;;  %vm174_vm2 = vcmask 1042432  }
  0x1c   :  { %439 = vmatpush.msra.mxu3 %v1316_v0  ;;  %v1332_v5 = vld [vmem:[#allocation11 + $0x58] sm:$0xff]  ;;  %832 = vmatpush.msra.mxu0 %v827_v4  ;;  %v826_v6 = vld [vmem:[#allocation12 + $0x70] sm:$0xff]  ;;  %v825_v7 = vld [vmem:[#allocation12 + $0x68] sm:$0xff]  ;;  %s118_s24 = sld [smem:[#allocation5]]  ;;  %vm176_vm3 = vcmask 1043456   ;;  %vm178_vm4 = vcmask 1044480  }
  0x1d   :  { %185 = vmatpush.msra.mxu1 %v1318_v1  ;;  %355 = vmatpush.msra.mxu2 %v1318_v1  ;;  %v1337_v8 = vld [vmem:[#allocation11 + $0x50] sm:$0xff]  ;;  %v824_v9 = vld [vmem:[#allocation12 + $0x60] sm:$0xff]  ;;  %v1342_v10 = vld [vmem:[#allocation11 + $0x48] sm:$0xff]  ;;  %s988_s25 = sld [smem:[#allocation5 + $0x3]]  ;;  %vm180_vm5 = vcmask 1045504   ;;  %vm182_vm6 = vcmask 1046528  }
  0x1e   :  { %440 = vmatpush.msra.mxu3 %v1318_v1  ;;  %833 = vmatpush.msra.mxu0 %v826_v6  ;;  %v823_v11 = vld [vmem:[#allocation12 + $0x58] sm:$0xff]  ;;  %v1347_v12 = vld [vmem:[#allocation11 + $0x40] sm:$0xff]  ;;  %v822_v13 = vld [vmem:[#allocation12 + $0x50] sm:$0xff]  ;;  %s989_s26 = sld [smem:[#allocation5 + $0x4]] }
  0x1f   :  { %186 = vmatpush.msra.mxu1 %v1322_v2  ;;  %356 = vmatpush.msra.mxu2 %v1322_v2  ;;  %v1352_v14 = vld [vmem:[#allocation11 + $0x38] sm:$0xff]  ;;  %v821_v15 = vld [vmem:[#allocation12 + $0x48] sm:$0xff]  ;;  %v1357_v16 = vld [vmem:[#allocation11 + $0x30] sm:$0xff]  ;;  %s990_s28 = sld [smem:[#allocation5 + $0x5]] }
  0x20   :  { %441 = vmatpush.msra.mxu3 %v1322_v2  ;;  %834 = vmatpush.msra.mxu0 %v825_v7  ;;  %v820_v17 = vld [vmem:[#allocation12 + $0x40] sm:$0xff]  ;;  %v1362_v18 = vld [vmem:[#allocation11 + $0x28] sm:$0xff]  ;;  %v819_v19 = vld [vmem:[#allocation12 + $0x38] sm:$0xff]  ;;  %s123_s27 = scalar_lea.vmem [#allocation9], %s986_s3  ;;  %s991_s8 = sld [smem:[#allocation5 + $0x6]] }
  0x21   :  { %187 = vmatpush.msra.mxu1 %v1327_v3  ;;  %357 = vmatpush.msra.mxu2 %v1327_v3  ;;  %v1367_v20 = vld [vmem:[#allocation11 + $0x20] sm:$0xff]  ;;  %v818_v21 = vld [vmem:[#allocation12 + $0x30] sm:$0xff]  ;;  %v1372_v22 = vld [vmem:[#allocation11 + $0x18] sm:$0xff]  ;;  %s127_s29 = scalar_lea.vmem [#allocation9], %s987_s4  ;;  %s992_s0 = sld [smem:[#allocation5 + $0x7]] }
  0x22   :  { %442 = vmatpush.msra.mxu3 %v1327_v3  ;;  %835 = vmatpush.msra.mxu0 %v824_v9  ;;  %v817_v23 = vld [vmem:[#allocation12 + $0x28] sm:$0xff]  ;;  %v1377_v24 = vld [vmem:[#allocation11 + $0x10] sm:$0xff]  ;;  %v1387_v26 = vld [vmem:[#allocation11] sm:$0xff]  ;;  %s119_s30 = scalar_lea.vmem [#allocation9], %s118_s24  ;;  %s994_s16 = sld [smem:[#allocation5 + $0x9]] }
  0x23   :  { %188 = vmatpush.msra.mxu1 %v1332_v5  ;;  %358 = vmatpush.msra.mxu2 %v1332_v5  ;;  %v1382_v25 = vld [vmem:[#allocation11 + $0x8] sm:$0xff]  ;;  %v98_v27 = vld [vmem:[#allocation6] sm:$0xff]  ;;  %v816_v28 = vld [vmem:[#allocation12 + $0x20] sm:$0xff]  ;;  %s131_s9 = scalar_lea.vmem [#allocation9], %s988_s25  ;;  %s995_s2 = sld [smem:[#allocation5 + $0xa]] }
  0x24   :  { %443 = vmatpush.msra.mxu3 %v1332_v5  ;;  %836 = vmatpush.msra.mxu0 %v823_v11  ;;  %v815_v29 = vld [vmem:[#allocation12 + $0x18] sm:$0xff]  ;;  %v814_v30 = vld [vmem:[#allocation12 + $0x10] sm:$0xff]  ;;  %v813_v31 = vld [vmem:[#allocation12 + $0x8] sm:$0xff]  ;;  %s135_s10 = scalar_lea.vmem [#allocation9], %s989_s26  ;;  %s993_s17 = sld [smem:[#allocation5 + $0x8]] }
  0x25   :  { %189 = vmatpush.msra.mxu1 %v1337_v8  ;;  %359 = vmatpush.msra.mxu2 %v1337_v8  ;;  %v124_v32 = vld [vmem:[%s123_s27] sm:$0x1]  ;;  %v812_v33 = vld [vmem:[#allocation12] sm:$0xff]  ;;  %s139_s11 = scalar_lea.vmem [#allocation9], %s990_s28  ;;  %s996_s18 = sld [smem:[#allocation5 + $0xb]] }
  0x26   :  { %444 = vmatpush.msra.mxu3 %v1337_v8  ;;  %837 = vmatpush.msra.mxu0 %v822_v13  ;;  %v128_v34 = vld [vmem:[%s127_s29] sm:$0x1]  ;;  %v150_v35 = vrot.slane %v124_v32, 7  ;;  %s143_s14 = scalar_lea.vmem [#allocation9], %s991_s8  ;;  %s997_s19 = sld [smem:[#allocation5 + $0xc]] }
  0x27   :  { %190 = vmatpush.msra.mxu1 %v1342_v10  ;;  %360 = vmatpush.msra.mxu2 %v1342_v10  ;;  %v120_v36 = vld [vmem:[%s119_s30] sm:$0x1]  ;;  %v153_v38 = vrot.slane %v128_v34, 6  ;;  %s147_s15 = scalar_lea.vmem [#allocation9], %s992_s0  ;;  %s998_s20 = sld [smem:[#allocation5 + $0xd]] }
  0x28   :  { %445 = vmatpush.msra.mxu3 %v1342_v10  ;;  %838 = vmatpush.msra.mxu0 %v821_v15  ;;  %v132_v37 = vld [vmem:[%s131_s9] sm:$0x1]  ;;  %v171_v39 = vsel %vm170_vm0, %v120_v36, %v150_v35  ;;  %s215_s1 = scalar_lea.vmem [#allocation9], %s994_s16  ;;  %s999_s23 = sld [smem:[#allocation5 + $0xe]] }
  0x29   :  { %191 = vmatpush.msra.mxu1 %v1347_v12  ;;  %361 = vmatpush.msra.mxu2 %v1347_v12  ;;  %v136_v40 = vld [vmem:[%s135_s10] sm:$0x1]  ;;  %v156_v41 = vrot.slane %v132_v37, 5  ;;  %v173_v42 = vsel %vm172_vm1, %v171_v39, %v153_v38  ;;  %s219_s21 = scalar_lea.vmem [#allocation9], %s995_s2  ;;  %s1000_s4 = sld [smem:[#allocation5 + $0xf]] }
  0x2a   :  { %446 = vmatpush.msra.mxu3 %v1347_v12  ;;  %839 = vmatpush.msra.mxu0 %v820_v17  ;;  %v140_v43 = vld [vmem:[%s139_s11] sm:$0x1]  ;;  %v159_v44 = vrot.slane %v136_v40, 4  ;;  %s211_s22 = scalar_lea.vmem [#allocation9], %s993_s17  ;;  %s1003_s30 = sld [smem:[#allocation5 + $0x12]] }
  0x2b   :  { %192 = vmatpush.msra.mxu1 %v1352_v14  ;;  %362 = vmatpush.msra.mxu2 %v1352_v14  ;;  %v175_v45 = vsel %vm174_vm2, %v173_v42, %v156_v41  ;;  %v144_v46 = vld [vmem:[%s143_s14] sm:$0x1]  ;;  %v162_v47 = vrot.slane %v140_v43, 3  ;;  %s223_s3 = scalar_lea.vmem [#allocation9], %s996_s18  ;;  %s1001_s8 = sld [smem:[#allocation5 + $0x10]] }
  0x2c   :  { %447 = vmatpush.msra.mxu3 %v1352_v14  ;;  %840 = vmatpush.msra.mxu0 %v819_v19  ;;  %v177_v48 = vsel %vm176_vm3, %v175_v45, %v159_v44  ;;  %v148_v49 = vld [vmem:[%s147_s15] sm:$0x1]  ;;  %v165_v50 = vrot.slane %v144_v46, 2  ;;  %s227_s24 = scalar_lea.vmem [#allocation9], %s997_s19  ;;  %s1004_s9 = sld [smem:[#allocation5 + $0x13]] }
  0x2d   :  { %193 = vmatpush.msra.mxu1 %v1357_v16  ;;  %363 = vmatpush.msra.mxu2 %v1357_v16  ;;  %v179_v51 = vsel %vm178_vm4, %v177_v48, %v162_v47  ;;  %v168_v52 = vrot.slane %v148_v49, 1  ;;  %v216_v58 = vld [vmem:[%s215_s1] sm:$0x1]  ;;  %s231_s25 = scalar_lea.vmem [#allocation9], %s998_s20  ;;  %s1005_s0 = sld [smem:[#allocation5 + $0x14]] }
  0x2e   :  { %448 = vmatpush.msra.mxu3 %v1357_v16  ;;  %841 = vmatpush.msra.mxu0 %v818_v21  ;;  %v181_v53 = vsel %vm180_vm5, %v179_v51, %v165_v50  ;;  %v220_v59 = vld [vmem:[%s219_s21] sm:$0x1]  ;;  %v242_v60 = vrot.slane %v216_v58, 7  ;;  %s235_s26 = scalar_lea.vmem [#allocation9], %s999_s23  ;;  %s1006_s11 = sld [smem:[#allocation5 + $0x15]] }
  0x2f   :  { %194 = vmatpush.msra.mxu1 %v1362_v18  ;;  %364 = vmatpush.msra.mxu2 %v1362_v18  ;;  %v183_v54 = vsel %vm182_vm6, %v181_v53, %v168_v52  ;;  %v212_v61 = vld [vmem:[%s211_s22] sm:$0x1]  ;;  %v245_v63 = vrot.slane %v220_v59, 6  ;;  %s239_s27 = scalar_lea.vmem [#allocation9], %s1000_s4  ;;  %s1007_s16 = sld [smem:[#allocation5 + $0x16]] }
  0x30   :  { %449 = vmatpush.msra.mxu3 %v1362_v18  ;;  %842 = vmatpush.msra.mxu0 %v817_v23  ;;  %v224_v62 = vld [vmem:[%s223_s3] sm:$0x1]  ;;  %v262_v4 = vsel %vm170_vm0, %v212_v61, %v242_v60  ;;  %s304_s14 = scalar_lea.vmem [#allocation9], %s1003_s30  ;;  %s1008_s17 = sld [smem:[#allocation5 + $0x17]] }
  0x31   :  { %195 = vmatpush.msra.mxu1 %v1367_v20  ;;  %365 = vmatpush.msra.mxu2 %v1367_v20  ;;  %v228_v6 = vld [vmem:[%s227_s24] sm:$0x1]  ;;  %v248_v7 = vrot.slane %v224_v62, 5  ;;  %v263_v9 = vsel %vm172_vm1, %v262_v4, %v245_v63  ;;  %s296_s15 = scalar_lea.vmem [#allocation9], %s1001_s8  ;;  %s1010_s21 = sld [smem:[#allocation5 + $0x19]] }
  0x32   :  { %450 = vmatpush.msra.mxu3 %v1367_v20  ;;  %843 = vmatpush.msra.mxu0 %v816_v28  ;;  %v232_v11 = vld [vmem:[%s231_s25] sm:$0x1]  ;;  %v251_v13 = vrot.slane %v228_v6, 4  ;;  %s308_s2 = scalar_lea.vmem [#allocation9], %s1004_s9  ;;  %s1011_s22 = sld [smem:[#allocation5 + $0x1a]] }
  0x33   :  { %196 = vmatpush.msra.mxu1 %v1372_v22  ;;  %366 = vmatpush.msra.mxu2 %v1372_v22  ;;  %v264_v15 = vsel %vm174_vm2, %v263_v9, %v248_v7  ;;  %v236_v17 = vld [vmem:[%s235_s26] sm:$0x1]  ;;  %v254_v19 = vrot.slane %v232_v11, 3  ;;  %s312_s18 = scalar_lea.vmem [#allocation9], %s1005_s0  ;;  %s1009_s23 = sld [smem:[#allocation5 + $0x18]] }
  0x34   :  { %451 = vmatpush.msra.mxu3 %v1372_v22  ;;  %844 = vmatpush.msra.mxu0 %v815_v29  ;;  %v265_v21 = vsel %vm176_vm3, %v264_v15, %v251_v13  ;;  %v240_v23 = vld [vmem:[%s239_s27] sm:$0x1]  ;;  %s316_s19 = scalar_lea.vmem [#allocation9], %s1006_s11  ;;  %s1012_s3 = sld [smem:[#allocation5 + $0x1b]] }
  0x35   :  { %197 = vmatpush.msra.mxu1 %v1377_v24  ;;  %367 = vmatpush.msra.mxu2 %v1377_v24  ;;  %v266_v28 = vsel %vm178_vm4, %v265_v21, %v254_v19  ;;  %v260_v29 = vrot.slane %v240_v23, 1  ;;  %s320_s1 = scalar_lea.vmem [#allocation9], %s1007_s16  ;;  %s1013_s4 = sld [smem:[#allocation5 + $0x1c]] }
  0x36   :  { %452 = vmatpush.msra.mxu3 %v1377_v24  ;;  %845 = vmatpush.msra.mxu0 %v814_v30  ;;  %s324_s20 = scalar_lea.vmem [#allocation9], %s1008_s17  ;;  %s1014_s25 = sld [smem:[#allocation5 + $0x1d]] }
  0x37   :  { %198 = vmatpush.msra.mxu1 %v1382_v25  ;;  %368 = vmatpush.msra.mxu2 %v1382_v25  ;;  %v325_v38 = vld [vmem:[%s324_s20] sm:$0x1]  ;;  %s385_s24 = scalar_lea.vmem [#allocation9], %s1010_s21  ;;  %s1015_s28 = sld [smem:[#allocation5 + $0x1e]] }
  0x38   :  { %453 = vmatpush.msra.mxu3 %v1382_v25  ;;  %846 = vmatpush.msra.mxu0 %v813_v31  ;;  %v1476_v31 = vld [vmem:[%s1559_s5] ss:$0 sm:$0xff]  ;;  %s1002_s5 = sld [smem:[#allocation5 + $0x11]]  ;;  %v345_v42 = vrot.slane %v325_v38, 1  ;;  %s389_s26 = scalar_lea.vmem [#allocation9], %s1011_s22 }
  0x39   :  { %199 = vmatpush.msra.mxu1 %v1387_v26  ;;  %369 = vmatpush.msra.mxu2 %v1387_v26  ;;  %v386_v49 = vld [vmem:[%s385_s24] sm:$0x1]  ;;  %s381_s27 = scalar_lea.vmem [#allocation9], %s1009_s23  ;;  %s1019_s11 = sld [smem:[#allocation5 + $0x22]] }
  0x3a   :  { %200 = vmatmul.f32.vlgmr.msra.gmra.mxu1 %v98_v27  ;;  %454 = vmatpush.msra.mxu3 %v1387_v26  ;;  %v257_v27 = vrot.slane %v236_v17, 2  ;;  %v390_v50 = vld [vmem:[%s389_s26] sm:$0x1]  ;;  %v412_v51 = vrot.slane %v386_v49, 7  ;;  %s393_s29 = scalar_lea.vmem [#allocation9], %s1012_s3  ;;  %s1021_s16 = sld [smem:[#allocation5 + $0x24]] }
  0x3b   :  { %269 = vmatpush.msrb.mxu1 %v1316_v0  ;;  %524 = vmatpush.msrb.mxu2 %v1316_v0  ;;  %v382_v52 = vld [vmem:[%s381_s27] sm:$0x1]  ;;  %s397_s30 = scalar_lea.vmem [#allocation9], %s1013_s4  ;;  %s1022_s17 = sld [smem:[#allocation5 + $0x25]] }
  0x3c   :  { %779 = vmatpush.msrb.mxu3 %v1316_v0  ;;  %847 = vmatpush.msra.mxu0 %v812_v33  ;;  %v267_v30 = vsel %vm180_vm5, %v266_v28, %v257_v27  ;;  %v394_v53 = vld [vmem:[%s393_s29] sm:$0x1]  ;;  %s401_s8 = scalar_lea.vmem [#allocation9], %s1014_s25  ;;  %s1024_s21 = sld [smem:[#allocation5 + $0x27]] }
  0x3d   :  { %270 = vmatpush.msrb.mxu1 %v1318_v1  ;;  %525 = vmatpush.msrb.mxu2 %v1318_v1  ;;  %v268_v32 = vsel %vm182_vm6, %v267_v30, %v260_v29  ;;  %v402_v59 = vld [vmem:[%s401_s8] sm:$0x1]  ;;  %s405_s9 = scalar_lea.vmem [#allocation9], %s1015_s28  ;;  %s1026_s24 = sld [smem:[#allocation5 + $0x29]] }
  0x3e   :  { %780 = vmatpush.msrb.mxu3 %v1318_v1  ;;  %s300_s10 = scalar_lea.vmem [#allocation9], %s1002_s5  ;;  %s1016_s5 = sld [smem:[#allocation5 + $0x1f]]  ;;  %v406_v62 = vld [vmem:[%s405_s9] sm:$0x1]  ;;  %v424_v63 = vrot.slane %v402_v59, 3 }
  0x3f   :  { %271 = vmatpush.msrb.mxu1 %v1322_v2  ;;  %526 = vmatpush.msrb.mxu2 %v1322_v2  ;;  %v427_v7 = vrot.slane %v406_v62, 2  ;;  %s1027_s25 = sld [smem:[#allocation5 + $0x2a]] }
  0x40   :  { %781 = vmatpush.msrb.mxu3 %v1322_v2  ;;  %s482_s22 = scalar_lea.vmem [#allocation9], %s1021_s16  ;;  %s1025_s26 = sld [smem:[#allocation5 + $0x28]] }
  0x41   :  { %272 = vmatpush.msrb.mxu1 %v1327_v3  ;;  %527 = vmatpush.msrb.mxu2 %v1327_v3  ;;  %s486_s23 = scalar_lea.vmem [#allocation9], %s1022_s17  ;;  %s1028_s27 = sld [smem:[#allocation5 + $0x2b]] }
  0x42   :  { %782 = vmatpush.msrb.mxu3 %v1327_v3  ;;  %s494_s4 = scalar_lea.vmem [#allocation9], %s1024_s21  ;;  %s1029_s28 = sld [smem:[#allocation5 + $0x2c]] }
  0x43   :  { %273 = vmatpush.msrb.mxu1 %v1332_v5  ;;  %528 = vmatpush.msrb.mxu2 %v1332_v5  ;;  %s555_s29 = scalar_lea.vmem [#allocation9], %s1026_s24  ;;  %s1031_s9 = sld [smem:[#allocation5 + $0x2e]] }
  0x44   :  { %783 = vmatpush.msrb.mxu3 %v1332_v5  ;;  %s409_s0 = scalar_lea.vmem [#allocation9], %s1016_s5  ;;  %s1030_s5 = sld [smem:[#allocation5 + $0x2d]] }
  0x45   :  { %274 = vmatpush.msrb.mxu1 %v1337_v8  ;;  %529 = vmatpush.msrb.mxu2 %v1337_v8  ;;  %v410_v6 = vld [vmem:[%s409_s0] sm:$0x1]  ;;  %s1035_s17 = sld [smem:[#allocation5 + $0x32]] }
  0x46   :  { %784 = vmatpush.msrb.mxu3 %v1337_v8  ;;  %v430_v13 = vrot.slane %v410_v6, 1  ;;  %s551_s8 = scalar_lea.vmem [#allocation9], %s1025_s26  ;;  %s1038_s21 = sld [smem:[#allocation5 + $0x35]] }
  0x47   :  { %275 = vmatpush.msrb.mxu1 %v1342_v10  ;;  %530 = vmatpush.msrb.mxu2 %v1342_v10  ;;  %s563_s0 = scalar_lea.vmem [#allocation9], %s1028_s27  ;;  %s1040_s24 = sld [smem:[#allocation5 + $0x37]] }
  0x48   :  { %785 = vmatpush.msrb.mxu3 %v1342_v10 }
  0x49   :  { %276 = vmatpush.msrb.mxu1 %v1347_v12  ;;  %531 = vmatpush.msrb.mxu2 %v1347_v12 }
  0x4a   :  { %786 = vmatpush.msrb.mxu3 %v1347_v12 }
  0x4b   :  { %277 = vmatpush.msrb.mxu1 %v1352_v14  ;;  %532 = vmatpush.msrb.mxu2 %v1352_v14 }
  0x4c   :  { %787 = vmatpush.msrb.mxu3 %v1352_v14  ;;  %s656_s26 = scalar_lea.vmem [#allocation9], %s1038_s21 }
  0x4d   :  { %278 = vmatpush.msrb.mxu1 %v1357_v16  ;;  %533 = vmatpush.msrb.mxu2 %v1357_v16 }
  0x4e   :  { %788 = vmatpush.msrb.mxu3 %v1357_v16 }
  0x4f   :  { %279 = vmatpush.msrb.mxu1 %v1362_v18  ;;  %534 = vmatpush.msrb.mxu2 %v1362_v18 }
  0x50   :  { %789 = vmatpush.msrb.mxu3 %v1362_v18 }
  0x51   :  { %280 = vmatpush.msrb.mxu1 %v1367_v20  ;;  %535 = vmatpush.msrb.mxu2 %v1367_v20 }
  0x52   :  { %790 = vmatpush.msrb.mxu3 %v1367_v20 }
  0x53   :  { %281 = vmatpush.msrb.mxu1 %v1372_v22  ;;  %536 = vmatpush.msrb.mxu2 %v1372_v22 }
  0x54   :  { %791 = vmatpush.msrb.mxu3 %v1372_v22 }
  0x55   :  { %282 = vmatpush.msrb.mxu1 %v1377_v24  ;;  %537 = vmatpush.msrb.mxu2 %v1377_v24 }
  0x56   :  { %792 = vmatpush.msrb.mxu3 %v1377_v24 }
  0x57   :  { %283 = vmatpush.msrb.mxu1 %v1382_v25  ;;  %538 = vmatpush.msrb.mxu2 %v1382_v25 }
  0x58   :  { %793 = vmatpush.msrb.mxu3 %v1382_v25 }
  0x59   :  { %284 = vmatpush.msrb.mxu1 %v1387_v26  ;;  %539 = vmatpush.msrb.mxu2 %v1387_v26 }
  0x5a   :  { %794 = vmatpush.msrb.mxu3 %v1387_v26 }
  0x5b   :  { %609 = vmatpush.msra.mxu1 %v1316_v0 }
  0x5d   :  { %610 = vmatpush.msra.mxu1 %v1318_v1 }
  0x5f   :  { %611 = vmatpush.msra.mxu1 %v1322_v2 }
  0x61   :  { %612 = vmatpush.msra.mxu1 %v1327_v3 }
  0x63   :  { %613 = vmatpush.msra.mxu1 %v1332_v5 }
  0x65   :  { %614 = vmatpush.msra.mxu1 %v1337_v8 }
  0x67   :  { %615 = vmatpush.msra.mxu1 %v1342_v10 }
  0x69   :  { %616 = vmatpush.msra.mxu1 %v1347_v12 }
  0x6b   :  { %617 = vmatpush.msra.mxu1 %v1352_v14 }
  0x6d   :  { %618 = vmatpush.msra.mxu1 %v1357_v16 }
  0x6f   :  { %619 = vmatpush.msra.mxu1 %v1362_v18 }
  0x71   :  { %620 = vmatpush.msra.mxu1 %v1367_v20 }
  0x73   :  { %621 = vmatpush.msra.mxu1 %v1372_v22 }
  0x75   :  { %622 = vmatpush.msra.mxu1 %v1377_v24 }
  0x77   :  { %623 = vmatpush.msra.mxu1 %v1382_v25 }
  0x79   :  { %624 = vmatpush.msra.mxu1 %v1387_v26 }
  0xb7   :  { %v201_v55 = vpop.f32.mrf.mxu1 }
  0xb8   :  { %v204_v56 = vadd.f32 %v201_v55, %v183_v54  ;;  %v415_v54 = vrot.slane %v390_v50, 6  ;;  %v432_v55 = vsel %vm170_vm0, %v382_v52, %v412_v51 }
  0xba   :  { %1059 = vtanh.f32 %v204_v56  ;;  %v398_v56 = vld [vmem:[%s397_s30] sm:$0x1]  ;;  %v433_v58 = vsel %vm172_vm1, %v432_v55, %v415_v54  ;;  %s559_s30 = scalar_lea.vmem [#allocation9], %s1027_s25 }
  0xbb   :  { %v421_v60 = vrot.slane %v398_v56, 4 }
  0xc0   :  { %v1060_v57 = vpop.eup %1059 }
  0xc1   :  { %285 = vmatmul.f32.vlgmr.msrb.gmra.mxu1 %v1060_v57  ;;  %848 = vmatmul.f32.vlgmr.msra.gmra.mxu0 %v1060_v57  ;;  %v418_v57 = vrot.slane %v394_v53, 5 }
  0xc3   :  { %v434_v61 = vsel %vm174_vm2, %v433_v58, %v418_v57 }
  0xc4   :  { %v435_v4 = vsel %vm176_vm3, %v434_v61, %v421_v60 }
  0xc5   :  { %v436_v9 = vsel %vm178_vm4, %v435_v4, %v424_v63 }
  0xc6   :  { %v437_v17 = vsel %vm180_vm5, %v436_v9, %v427_v7 }
  0xc7   :  { %v438_v19 = vsel %vm182_vm6, %v437_v17, %v430_v13 }
 0x13e   :  { %v286_v33 = vpop.f32.mrf.mxu1  ;;  %v849_v34 = vpop.f32.mrf.mxu0 }
 0x13f   :  { %v289_v35 = vadd.f32 %v286_v33, %v268_v32  ;;  %v850_v36 = vadd.f32 %v1476_v31, %v849_v34 }
 0x141   :  { %1061 = vtanh.f32 %v289_v35  ;;  %873 = vst [vmem:[#allocation14] sm:$0xff] %v850_v36  ;;  %v483_v36 = vld [vmem:[%s482_s22] sm:$0x1]  ;;  %s644_s22 = scalar_lea.vmem [#allocation9], %s1035_s17 }
 0x147   :  { %v1062_v37 = vpop.eup %1061 }
 0x148   :  { %370 = vmatmul.f32.vlgmr.msra.gmra.mxu2 %v1062_v37  ;;  %851 = vmatmul.f32.gmra.mxu0 %v1062_v37 }
 0x149   :  { %694 = vmatpush.msra.mxu2 %v1316_v0  ;;  %v301_v0 = vld [vmem:[%s300_s10] sm:$0x1]  ;;  %s1018_s10 = sld [smem:[#allocation5 + $0x21]] }
 0x14b   :  { %695 = vmatpush.msra.mxu2 %v1318_v1  ;;  %v305_v1 = vld [vmem:[%s304_s14] sm:$0x1]  ;;  %s1017_s14 = sld [smem:[#allocation5 + $0x20]] }
 0x14d   :  { %696 = vmatpush.msra.mxu2 %v1322_v2  ;;  %v327_v2 = vrot.slane %v301_v0, 7 }
 0x14f   :  { %697 = vmatpush.msra.mxu2 %v1327_v3  ;;  %v297_v3 = vld [vmem:[%s296_s15] sm:$0x1]  ;;  %s1020_s15 = sld [smem:[#allocation5 + $0x23]] }
 0x151   :  { %698 = vmatpush.msra.mxu2 %v1332_v5  ;;  %v309_v5 = vld [vmem:[%s308_s2] sm:$0x1]  ;;  %s470_s2 = scalar_lea.vmem [#allocation9], %s1018_s10  ;;  %s1032_s10 = sld [smem:[#allocation5 + $0x2f]] }
 0x152   :  { %v471_v28 = vld [vmem:[%s470_s2] sm:$0x1]  ;;  %s1034_s2 = sld [smem:[#allocation5 + $0x31]] }
 0x153   :  { %699 = vmatpush.msra.mxu2 %v1337_v8  ;;  %v330_v8 = vrot.slane %v305_v1, 6  ;;  %v497_v30 = vrot.slane %v471_v28, 7  ;;  %v487_v1 = vld [vmem:[%s486_s23] sm:$0x1] }
 0x155   :  { %700 = vmatpush.msra.mxu2 %v1342_v10  ;;  %v347_v10 = vsel %vm170_vm0, %v297_v3, %v327_v2  ;;  %s478_s20 = scalar_lea.vmem [#allocation9], %s1020_s15  ;;  %v506_v2 = vrot.slane %v483_v36, 4  ;;  %s575_s15 = scalar_lea.vmem [#allocation9], %s1031_s9 }
 0x156   :  { %v479_v33 = vld [vmem:[%s478_s20] sm:$0x1]  ;;  %s1045_s9 = sld [smem:[#allocation5 + $0x3c]] }
 0x157   :  { %701 = vmatpush.msra.mxu2 %v1347_v12  ;;  %v313_v12 = vld [vmem:[%s312_s18] sm:$0x1]  ;;  %s474_s18 = scalar_lea.vmem [#allocation9], %s1019_s11  ;;  %v503_v37 = vrot.slane %v479_v33, 5  ;;  %s567_s11 = scalar_lea.vmem [#allocation9], %s1029_s28 }
 0x158   :  { %v475_v29 = vld [vmem:[%s474_s18] sm:$0x1]  ;;  %s579_s16 = scalar_lea.vmem [#allocation9], %s1032_s10  ;;  %s1033_s18 = sld [smem:[#allocation5 + $0x30]] }
 0x159   :  { %702 = vmatpush.msra.mxu2 %v1352_v14  ;;  %v333_v14 = vrot.slane %v309_v5, 5  ;;  %v500_v34 = vrot.slane %v475_v29, 6  ;;  %v576_v53 = vld [vmem:[%s575_s15] sm:$0x1]  ;;  %s640_s20 = scalar_lea.vmem [#allocation9], %s1034_s2  ;;  %s664_s28 = scalar_lea.vmem [#allocation9], %s1040_s24 }
 0x15a   :  { %v580_v56 = vld [vmem:[%s579_s16] sm:$0x1]  ;;  %v597_v57 = vrot.slane %v576_v53, 2  ;;  %s1046_s10 = sld [smem:[#allocation5 + $0x3d]] }
 0x15b   :  { %703 = vmatpush.msra.mxu2 %v1357_v16  ;;  %v348_v16 = vsel %vm172_vm1, %v347_v10, %v330_v8  ;;  %v509_v8 = vrot.slane %v487_v1, 3  ;;  %v600_v59 = vrot.slane %v580_v56, 1  ;;  %v641_v9 = vld [vmem:[%s640_s20] sm:$0x1]  ;;  %s1047_s15 = sld [smem:[#allocation5 + $0x3e]]  ;;  %s1250_s20 = smov [#allocation15]  }
 0x15c   :  { %v667_v13 = vrot.slane %v641_v9, 7  ;;  %v657_v29 = vld [vmem:[%s656_s26] sm:$0x1]  ;;  %s1048_s2 = sld [smem:[#allocation5 + $0x3f]]  ;;  %s737_s17 = scalar_lea.vmem [#allocation9], %s1045_s9 }
 0x15d   :  { %704 = vmatpush.msra.mxu2 %v1362_v18  ;;  %v317_v18 = vld [vmem:[%s316_s19] sm:$0x1]  ;;  %s466_s19 = scalar_lea.vmem [#allocation9], %s1017_s14  ;;  %s571_s14 = scalar_lea.vmem [#allocation9], %s1030_s5 }
 0x15e   :  { %v467_v32 = vld [vmem:[%s466_s19] sm:$0x1]  ;;  %s1036_s19 = sld [smem:[#allocation5 + $0x33]]  ;;  %s636_s23 = scalar_lea.vmem [#allocation9], %s1033_s18 }
 0x15f   :  { %705 = vmatpush.msra.mxu2 %v1367_v20  ;;  %v336_v20 = vrot.slane %v313_v12, 4  ;;  %v517_v35 = vsel %vm170_vm0, %v467_v32, %v497_v30  ;;  %v495_v12 = vld [vmem:[%s494_s4] sm:$0x1]  ;;  %s1043_s5 = sld [smem:[#allocation5 + $0x3a]]  ;;  %s903_s21 = sshll.u32 %s1250_s20, 4  ;;  %s904_s21 = int_to_ptr.vmem [resolvable:$true] %s903_s21 }
 0x160   :  { %v518_v0 = vsel %vm172_vm1, %v517_v35, %v500_v34  ;;  %v572_v50 = vld [vmem:[%s571_s14] sm:$0x1]  ;;  %v679_v34 = vrot.slane %v657_v29, 3  ;;  %s741_s18 = scalar_lea.vmem [#allocation9], %s1046_s10 }
 0x161   :  { %706 = vmatpush.msra.mxu2 %v1372_v22  ;;  %v349_v22 = vsel %vm174_vm2, %v348_v16, %v333_v14  ;;  %v519_v3 = vsel %vm174_vm2, %v518_v0, %v503_v37  ;;  %v594_v54 = vrot.slane %v572_v50, 3  ;;  %v665_v36 = vld [vmem:[%s664_s28] sm:$0x1] }
 0x162   :  { %v520_v10 = vsel %vm176_vm3, %v519_v3, %v506_v2  ;;  %v685_v2 = vrot.slane %v665_v36, 1 }
 0x163   :  { %707 = vmatpush.msra.mxu2 %v1377_v24  ;;  %v321_v24 = vld [vmem:[%s320_s1] sm:$0x1]  ;;  %s1023_s1 = sld [smem:[#allocation5 + $0x26]]  ;;  %v521_v16 = vsel %vm178_vm4, %v520_v10, %v509_v8 }
 0x164   :  { %v342_v39 = vrot.slane %v321_v24, 2  ;;  %s648_s4 = scalar_lea.vmem [#allocation9], %s1036_s19  ;;  %s745_s19 = scalar_lea.vmem [#allocation9], %s1047_s15 }
 0x165   :  { %708 = vmatpush.msra.mxu2 %v1382_v25  ;;  %v339_v25 = vrot.slane %v317_v18, 3  ;;  %v649_v17 = vld [vmem:[%s648_s4] sm:$0x1]  ;;  %s1251_s4 = smov [#allocation14]  }
 0x166   :  { %s889_s24 = sshll.u32 %s1251_s4, 4  ;;  %s890_s24 = int_to_ptr.vmem [resolvable:$true] %s889_s24 }
 0x167   :  { %709 = vmatpush.msra.mxu2 %v1387_v26  ;;  %v350_v26 = vsel %vm176_vm3, %v349_v22, %v336_v20  ;;  %v515_v20 = vrot.slane %v495_v12, 1 }
 0x168   :  { %v351_v40 = vsel %vm178_vm4, %v350_v26, %v339_v25 }
 0x169   :  { %v352_v44 = vsel %vm180_vm5, %v351_v40, %v342_v39  ;;  %s490_s3 = scalar_lea.vmem [#allocation9], %s1023_s1  ;;  %v556_v40 = vld [vmem:[%s555_s29] sm:$0x1]  ;;  %s1037_s1 = sld [smem:[#allocation5 + $0x34]] }
 0x16a   :  { %v353_v45 = vsel %vm182_vm6, %v352_v44, %v345_v42  ;;  %v491_v5 = vld [vmem:[%s490_s3] sm:$0x1]  ;;  %v582_v42 = vrot.slane %v556_v40, 7  ;;  %s1039_s3 = sld [smem:[#allocation5 + $0x36]] }
 0x16b   :  { %v512_v14 = vrot.slane %v491_v5, 2  ;;  %v564_v44 = vld [vmem:[%s563_s0] sm:$0x1]  ;;  %s1042_s29 = sld [smem:[#allocation5 + $0x39]] }
 0x16d   :  { %v522_v24 = vsel %vm180_vm5, %v521_v16, %v512_v14 }
 0x16e   :  { %v523_v25 = vsel %vm182_vm6, %v522_v24, %v515_v20 }
 0x16f   :  { %s652_s25 = scalar_lea.vmem [#allocation9], %s1037_s1  ;;  %s749_s1 = scalar_lea.vmem [#allocation9], %s1048_s2 }
 0x170   :  { %s660_s27 = scalar_lea.vmem [#allocation9], %s1039_s3  ;;  %s905_s3 = sshll.u32 %s1561_s7, 4  ;;  %s906_s3 = int_to_ptr.hbm [resolvable:$true] %s905_s3 }
 0x171   :  { %v661_v33 = vld [vmem:[%s660_s27] sm:$0x1]  ;;  %s725_s0 = scalar_lea.vmem [#allocation9], %s1042_s29  ;;  %s891_s27 = sshll.u32 %s1560_s6, 4  ;;  %s892_s27 = int_to_ptr.hbm [resolvable:$true] %s891_s27 }
 0x172   :  { %v682_v37 = vrot.slane %v661_v33, 2  ;;  %v726_v16 = vld [vmem:[%s725_s0] sm:$0x1] }
 0x173   :  { %v752_v20 = vrot.slane %v726_v16, 7 }
 0x1c5   :  { %v852_v41 = vpop.f32.mrf.mxu0 }
 0x1c6   :  { %v853_v43 = vadd.f32 %v1476_v31, %v852_v41  ;;  %v560_v41 = vld [vmem:[%s559_s30] sm:$0x1]  ;;  %s1041_s30 = sld [smem:[#allocation5 + $0x38]] }
 0x1c8   :  { %874 = vst [vmem:[#allocation14 + $0x8] sm:$0xff] %v853_v43  ;;  %v552_v43 = vld [vmem:[%s551_s8] sm:$0x1]  ;;  %s1044_s8 = sld [smem:[#allocation5 + $0x3b]] }
 0x1cb   :  { %v371_v46 = vpop.f32.mrf.mxu2 }
 0x1cc   :  { %v374_v47 = vadd.f32 %v371_v46, %v353_v45  ;;  %v585_v45 = vrot.slane %v560_v41, 6  ;;  %v602_v46 = vsel %vm170_vm0, %v552_v43, %v582_v42  ;;  %s721_s14 = scalar_lea.vmem [#allocation9], %s1041_s30  ;;  %v742_v41 = vld [vmem:[%s741_s18] sm:$0x1] }
 0x1ce   :  { %1063 = vtanh.f32 %v374_v47  ;;  %v568_v47 = vld [vmem:[%s567_s11] sm:$0x1]  ;;  %v603_v49 = vsel %vm172_vm1, %v602_v46, %v585_v45  ;;  %s729_s11 = scalar_lea.vmem [#allocation9], %s1043_s5  ;;  %s733_s16 = scalar_lea.vmem [#allocation9], %s1044_s8  ;;  %v764_v45 = vrot.slane %v742_v41, 3 }
 0x1cf   :  { %v591_v51 = vrot.slane %v568_v47, 4  ;;  %v734_v24 = vld [vmem:[%s733_s16] sm:$0x1] }
 0x1d0   :  { %v750_v47 = vld [vmem:[%s749_s1] sm:$0x1] }
 0x1d4   :  { %v1064_v48 = vpop.eup %1063 }
 0x1d5   :  { %455 = vmatmul.f32.vlgmr.msra.gmra.mxu3 %v1064_v48  ;;  %854 = vmatmul.f32.gmra.mxu0 %v1064_v48  ;;  %v588_v48 = vrot.slane %v564_v44, 5  ;;  %v746_v44 = vld [vmem:[%s745_s19] sm:$0x1] }
 0x1d7   :  { %v604_v52 = vsel %vm174_vm2, %v603_v49, %v588_v48  ;;  %v767_v48 = vrot.slane %v746_v44, 2 }
 0x1d8   :  { %v605_v55 = vsel %vm176_vm3, %v604_v52, %v591_v51  ;;  %v770_v51 = vrot.slane %v750_v47, 1 }
 0x1d9   :  { %v606_v58 = vsel %vm178_vm4, %v605_v55, %v594_v54 }
 0x1da   :  { %v607_v60 = vsel %vm180_vm5, %v606_v58, %v597_v57 }
 0x1db   :  { %v608_v61 = vsel %vm182_vm6, %v607_v60, %v600_v59 }
 0x252   :  { %v855_v11 = vpop.f32.mrf.mxu0 }
 0x253   :  { %v856_v15 = vadd.f32 %v1476_v31, %v855_v11  ;;  %v645_v11 = vld [vmem:[%s644_s22] sm:$0x1] }
 0x255   :  { %875 = vst [vmem:[#allocation14 + $0x10] sm:$0xff] %v856_v15  ;;  %v637_v15 = vld [vmem:[%s636_s23] sm:$0x1] }
 0x258   :  { %v456_v21 = vpop.f32.mrf.mxu3 }
 0x259   :  { %v459_v23 = vadd.f32 %v456_v21, %v438_v19  ;;  %v670_v19 = vrot.slane %v645_v11, 6  ;;  %v687_v21 = vsel %vm170_vm0, %v637_v15, %v667_v13 }
 0x25b   :  { %1065 = vtanh.f32 %v459_v23  ;;  %v653_v23 = vld [vmem:[%s652_s25] sm:$0x1]  ;;  %v688_v28 = vsel %vm172_vm1, %v687_v21, %v670_v19 }
 0x25c   :  { %v676_v30 = vrot.slane %v653_v23, 4 }
 0x261   :  { %v1066_v27 = vpop.eup %1065 }
 0x262   :  { %540 = vmatmul.f32.vlgmr.msrb.gmra.mxu2 %v1066_v27  ;;  %857 = vmatmul.f32.gmra.mxu0 %v1066_v27  ;;  %v673_v27 = vrot.slane %v649_v17, 5 }
 0x264   :  { %v689_v32 = vsel %vm174_vm2, %v688_v28, %v673_v27 }
 0x265   :  { %v690_v35 = vsel %vm176_vm3, %v689_v32, %v676_v30 }
 0x266   :  { %v691_v0 = vsel %vm178_vm4, %v690_v35, %v679_v34 }
 0x267   :  { %v692_v5 = vsel %vm180_vm5, %v691_v0, %v682_v37 }
 0x268   :  { %v693_v8 = vsel %vm182_vm6, %v692_v5, %v685_v2 }
 0x2df   :  { %v858_v18 = vpop.f32.mrf.mxu0 }
 0x2e0   :  { %v859_v22 = vadd.f32 %v1476_v31, %v858_v18  ;;  %v730_v18 = vld [vmem:[%s729_s11] sm:$0x1] }
 0x2e2   :  { %876 = vst [vmem:[#allocation14 + $0x18] sm:$0xff] %v859_v22  ;;  %v722_v22 = vld [vmem:[%s721_s14] sm:$0x1] }
 0x2e5   :  { %v541_v26 = vpop.f32.mrf.mxu2 }
 0x2e6   :  { %v544_v38 = vadd.f32 %v541_v26, %v523_v25  ;;  %v755_v25 = vrot.slane %v730_v18, 6  ;;  %v772_v26 = vsel %vm170_vm0, %v722_v22, %v752_v20 }
 0x2e8   :  { %1067 = vtanh.f32 %v544_v38  ;;  %v738_v38 = vld [vmem:[%s737_s17] sm:$0x1]  ;;  %v773_v40 = vsel %vm172_vm1, %v772_v26, %v755_v25 }
 0x2e9   :  { %v761_v42 = vrot.slane %v738_v38, 4 }
 0x2ee   :  { %v1068_v39 = vpop.eup %1067 }
 0x2ef   :  { %625 = vmatmul.f32.vlgmr.msra.gmra.mxu1 %v1068_v39  ;;  %860 = vmatmul.f32.gmra.mxu0 %v1068_v39  ;;  %v758_v39 = vrot.slane %v734_v24, 5 }
 0x2f1   :  { %v774_v43 = vsel %vm174_vm2, %v773_v40, %v758_v39 }
 0x2f2   :  { %v775_v46 = vsel %vm176_vm3, %v774_v43, %v761_v42 }
 0x2f3   :  { %v776_v49 = vsel %vm178_vm4, %v775_v46, %v764_v45 }
 0x2f4   :  { %v777_v53 = vsel %vm180_vm5, %v776_v49, %v767_v48 }
 0x2f5   :  { %v778_v54 = vsel %vm182_vm6, %v777_v53, %v770_v51 }
 0x36c   :  { %v626_v62 = vpop.f32.mrf.mxu1  ;;  %v861_v63 = vpop.f32.mrf.mxu0 }
 0x36d   :  { %v629_v4 = vadd.f32 %v626_v62, %v608_v61  ;;  %v862_v6 = vadd.f32 %v1476_v31, %v861_v63 }
 0x36f   :  { %1069 = vtanh.f32 %v629_v4  ;;  %877 = vst [vmem:[#allocation14 + $0x20] sm:$0xff] %v862_v6 }
 0x375   :  { %v1070_v7 = vpop.eup %1069 }
 0x376   :  { %710 = vmatmul.f32.vlgmr.msra.gmra.mxu2 %v1070_v7  ;;  %863 = vmatmul.f32.gmra.mxu0 %v1070_v7 }
 0x3f3   :  { %v864_v1 = vpop.f32.mrf.mxu0 }
 0x3f4   :  { %v865_v3 = vadd.f32 %v1476_v31, %v864_v1 }
 0x3f6   :  { %878 = vst [vmem:[#allocation14 + $0x28] sm:$0xff] %v865_v3 }
 0x3f9   :  { %v711_v10 = vpop.f32.mrf.mxu2 }
 0x3fa   :  { %v714_v12 = vadd.f32 %v711_v10, %v693_v8 }
 0x3fc   :  { %1071 = vtanh.f32 %v714_v12 }
 0x402   :  { %v1072_v14 = vpop.eup %1071 }
 0x403   :  { %795 = vmatmul.f32.vlgmr.msrb.gmra.mxu3 %v1072_v14  ;;  %866 = vmatmul.f32.gmra.mxu0 %v1072_v14 }
 0x480   :  { %v867_v50 = vpop.f32.mrf.mxu0 }
 0x481   :  { %v868_v52 = vadd.f32 %v1476_v31, %v867_v50 }
 0x483   :  { %879 = vst [vmem:[#allocation14 + $0x30] sm:$0xff] %v868_v52 }
 0x486   :  { %v796_v55 = vpop.f32.mrf.mxu3 }
 0x487   :  { %v799_v56 = vadd.f32 %v796_v55, %v778_v54 }
 0x489   :  { %1073 = vtanh.f32 %v799_v56 }
 0x48f   :  { %v1074_v57 = vpop.eup %1073 }
 0x490   :  { %884 = vst [vmem:[#allocation15] sm:$0xff] %v1074_v57  ;;  %869 = vmatmul.f32.gmra.mxu0 %v1074_v57 }
 0x491   :  { %908 = dma.vmem_to_hbm [thread:$0]  %s904_s21, 128, %s906_s3, [#allocation16]  }
 0x50d   :  { %v870_v58 = vpop.f32.mrf.mxu0 }
 0x50e   :  { %v871_v59 = vadd.f32 %v1476_v31, %v870_v58 }
 0x510   :  { %880 = vst [vmem:[#allocation14 + $0x38] sm:$0xff] %v871_v59 }
 0x511   :  { %897 = dma.vmem_to_hbm [thread:$0]  %s890_s24, 1024, %s892_s27, [#allocation8], %s1245_s12, %s1245_s12, %s1246_s13  }
 0x512   :  { %1239 = dma.done.wait [#allocation8], 1024  }
 0x513   :  { %1240 = vsyncadd [#allocation8], 4294966272 }
 0x514   :  { %1241 = dma.done.wait [#allocation16], 128  }
 0x515   :  { %1242 = vsyncadd [#allocation16], 4294967168 }
 0x516   :  { %917 = vsyncpa [#allocation7], 1 }
 0x517   :  { %918 = vsyncpa [#allocation10], 1 }
 0x518   :  { %919 = vsyncpa [#allocation13], 1 }
 0x519   :  { %920 = vsyncpa [#allocation8], 1 }
 0x51a   :  { %921 = vsyncpa [#allocation16], 1 }

</bundles_post_ra>
